<compile_context>
chip_gen: v7x
topology: tpu7x:2x2x1
jax: 0.10.0
libtpu: 0.0.40
codegen_flags: <defaults>
</compile_context>

<pallas_src>
import jax
import jax.numpy as jnp
import numpy as np
from jax.experimental import pallas as pl
from jax.experimental.pallas import tpu as pltpu

# ----------------- LSTMEncoder hyper-parameters (small demo shapes) ------------------
INPUT_SIZE = 4
HIDDEN = 32            # 4*HIDDEN = 128 -> gate matmuls are exactly one lane-width wide
OUTPUT_SIZE = 16
DEPTH = 2
LAST_SEQ = False

N_BATCH = 2
SEQ = 8
OPAD = 128             # FC output padded to a full lane width (lane-dense stores)

_VMEM = pl.BlockSpec(memory_space=pltpu.MemorySpace.VMEM)
_SMEM = pl.BlockSpec(memory_space=pltpu.MemorySpace.SMEM)


# ================================ fused Pallas kernel =================================
def _make_lstm_kernel(depth, seq, hidden, in_size, out_pad, last_seq):
    """Whole LSTMEncoder forward in one gridless kernel.

    refs layout:
      inputs : x (n, seq*in_size), w_ih[0..d), w_hh[0..d), b[0..d),
               w_fc (H, OPAD), b_fc (1, OPAD), prelu_a (1,) in SMEM
      outputs: y, h_n (depth, n, H), c_n (depth, n, H)
    All weights/biases arrive pre-transposed and pre-scaled (see prepare_params):
    columns of the i/f/o gates carry x/2 so one tanh yields all four activations.
    """
    H = hidden
    f32 = jnp.float32

    def kernel(*refs):
        x_ref = refs[0]
        w_ih = refs[1:1 + depth]
        w_hh = refs[1 + depth:1 + 2 * depth]
        b_g = refs[1 + 2 * depth:1 + 3 * depth]
        w_fc_ref = refs[1 + 3 * depth]
        b_fc_ref = refs[2 + 3 * depth]
        a_ref = refs[3 + 3 * depth]
        out_ref = refs[4 + 3 * depth]
        hn_ref = refs[5 + 3 * depth]
        cn_ref = refs[6 + 3 * depth]

        # hoist all weight loads out of the recurrence
        xv = x_ref[...]                                   # (n, seq*in_size)
        w_ih_v = [r[...] for r in w_ih]                   # layer 0: (I,4H); others (H,4H)
        w_hh_v = [r[...] for r in w_hh]                   # (H, 4H)
        b_v = [r[...] for r in b_g]                       # (1, 4H)
        w_fc = w_fc_ref[...]                              # (H, OPAD)
        b_fc = b_fc_ref[...]                              # (1, OPAD)
        alpha = a_ref[0]                                  # PReLU slope (scalar, SMEM)

        # layer-0 input projections for ALL timesteps: independent of the recurrence,
        # so the scheduler can overlap them with the serial chain.
        xg = [
            jnp.dot(xv[:, ti * in_size:(ti + 1) * in_size], w_ih_v[0],
                    preferred_element_type=f32) + b_v[0]
            for ti in range(seq)
        ]

        # register-carried recurrent state (written to hn/cn refs only once at the end)
        h = [None] * depth
        c = [None] * depth

        # -------- wavefront schedule: step s advances layer l's timestep s-l ---------
        # Layers are visited in decreasing l so each layer reads the *previous* step's
        # output of the layer below.  Cells within one step are mutually independent,
        # letting their MXU / EUP work overlap.
        for s in range(seq + depth - 1):
            for l in reversed(range(depth)):
                ti = s - l
                if ti < 0 or ti >= seq:
                    continue

                # gate pre-activations (i/f/o columns already pre-scaled by 0.5)
                if l == 0:
                    gates = xg[ti]
                else:
                    gates = jnp.dot(h[l - 1], w_ih_v[l],
                                    preferred_element_type=f32) + b_v[l]
                if ti > 0:   # t==0 peeled: h starts at zero -> no recurrent matmul
                    gates = gates + jnp.dot(h[l], w_hh_v[l],
                                            preferred_element_type=f32)

                # one full-width tanh covers all four gates
                tg = jnp.tanh(gates)                       # (n, 4H)
                i_g = 0.5 * tg[:, 0 * H:1 * H] + 0.5       # sigmoid(x) = .5*(1+tanh(x/2))
                f_g = 0.5 * tg[:, 1 * H:2 * H] + 0.5
                g_g = tg[:, 2 * H:3 * H]
                o_g = 0.5 * tg[:, 3 * H:4 * H] + 0.5

                c_new = i_g * g_g if ti == 0 else f_g * c[l] + i_g * g_g
                h_new = o_g * jnp.tanh(c_new)
                c[l] = c_new
                h[l] = h_new

                # fused FC + PReLU epilogue, lane-dense 128-wide aligned stores,
                # overlapped with the remaining recurrence.
                if l == depth - 1 and ((not last_seq) or ti == seq - 1):
                    y = jnp.dot(h_new, w_fc, preferred_element_type=f32) + b_fc
                    y = jnp.maximum(y, 0.0) + alpha * jnp.minimum(y, 0.0)
                    if last_seq:
                        out_ref[...] = y
                    else:
                        out_ref[:, ti * out_pad:(ti + 1) * out_pad] = y

        # final LSTM state written exactly once per layer
        for l in range(depth):
            hn_ref[l, ...] = h[l]
            cn_ref[l, ...] = c[l]

    return kernel


# ================================ jitted forward ======================================
@jax.jit
def lstm_encoder_forward(x, prep):
    n, t, in_size = x.shape
    # the ONLY input-side layout op: contiguous (row-major) reshape, no transpose/pad
    x2 = x.reshape(n, t * in_size)

    kernel = _make_lstm_kernel(DEPTH, t, HIDDEN, in_size, OPAD, LAST_SEQ)
    out_cols = OPAD if LAST_SEQ else t * OPAD
    n_in = 3 * DEPTH + 4

    y_flat, h_n, c_n = pl.pallas_call(
        kernel,
        out_shape=(jax.ShapeDtypeStruct((n, out_cols), jnp.float32),
                   jax.ShapeDtypeStruct((DEPTH, n, HIDDEN), jnp.float32),
                   jax.ShapeDtypeStruct((DEPTH, n, HIDDEN), jnp.float32)),
        in_specs=[_VMEM] * (n_in - 1) + [_SMEM],
        out_specs=(_VMEM, _VMEM, _VMEM),
    )(x2, *prep['w_ih_t'], *prep['w_hh_t'], *prep['b'],
      prep['w_fc_t'], prep['b_fc'], prep['a'])

    if LAST_SEQ:
        y = y_flat[:, :OUTPUT_SIZE]
    else:
        y = y_flat.reshape(n, t, OPAD)[:, :, :OUTPUT_SIZE]
    return y, (h_n, c_n)


# ============================= params (torch-style init) ==============================
def init_params(seed=0):
    keys = iter(jax.random.split(jax.random.PRNGKey(seed), 4 * DEPTH + 4))
    k = 1.0 / np.sqrt(HIDDEN)                        # nn.LSTM / nn.Linear uniform init
    params = {'w_ih': [], 'w_hh': [], 'b_ih': [], 'b_hh': []}
    for l in range(DEPTH):
        in_l = INPUT_SIZE if l == 0 else HIDDEN
        params['w_ih'].append(jax.random.uniform(next(keys), (4 * HIDDEN, in_l),
                                                 jnp.float32, -k, k))
        params['w_hh'].append(jax.random.uniform(next(keys), (4 * HIDDEN, HIDDEN),
                                                 jnp.float32, -k, k))
        params['b_ih'].append(jax.random.uniform(next(keys), (4 * HIDDEN,),
                                                 jnp.float32, -k, k))
        params['b_hh'].append(jax.random.uniform(next(keys), (4 * HIDDEN,),
                                                 jnp.float32, -k, k))
    params['w_fc'] = jax.random.uniform(next(keys), (OUTPUT_SIZE, HIDDEN),
                                        jnp.float32, -k, k)
    params['b_fc'] = jax.random.uniform(next(keys), (OUTPUT_SIZE,),
                                        jnp.float32, -k, k)
    params['prelu_a'] = jnp.float32(0.25)            # nn.PReLU default
    return params


def prepare_params(params):
    """One-time layout prep OUTSIDE the jitted forward.

    - transpose weights so the kernel does plain (M,K)@(K,N) matmuls
    - fold the two LSTM biases into one
    - pre-scale i/f/o gate columns by 0.5 so sigmoid(x) = 0.5*(1 + tanh(column))
    - zero-pad the FC weight/bias to 128 output lanes (lane-dense stores)
    """
    H = HIDDEN
    scale = jnp.concatenate([jnp.full((2 * H,), 0.5, jnp.float32),    # i, f
                             jnp.ones((H,), jnp.float32),             # g (tanh, unscaled)
                             jnp.full((H,), 0.5, jnp.float32)])       # o
    w_ih_t, w_hh_t, b = [], [], []
    for l in range(DEPTH):
        w_ih_t.append(jnp.asarray(params['w_ih'][l]).T * scale)       # (in_l, 4H)
        w_hh_t.append(jnp.asarray(params['w_hh'][l]).T * scale)       # (H, 4H)
        b.append(((params['b_ih'][l] + params['b_hh'][l]) * scale)
                 .reshape(1, 4 * H))
    w_fc_t = jnp.zeros((H, OPAD), jnp.float32).at[:, :OUTPUT_SIZE].set(
        jnp.asarray(params['w_fc']).T)                                # (H, OPAD)
    b_fc = jnp.zeros((1, OPAD), jnp.float32).at[0, :OUTPUT_SIZE].set(
        params['b_fc'])
    return {
        'w_ih_t': w_ih_t,
        'w_hh_t': w_hh_t,
        'b': b,
        'w_fc_t': w_fc_t,
        'b_fc': b_fc,
        'a': jnp.asarray(params['prelu_a'], jnp.float32).reshape(1,),  # 1-D SMEM scalar
    }


# ============================= pure-JAX reference (sanity) ============================
def ref_forward(x, params):
    n, t, _ = x.shape
    h_n, c_n = [], []
    inp = x
    for l in range(DEPTH):
        w_ih, w_hh = params['w_ih'][l], params['w_hh'][l]
        b = params['b_ih'][l] + params['b_hh'][l]
        h = jnp.zeros((n, HIDDEN), jnp.float32)
        c = jnp.zeros((n, HIDDEN), jnp.float32)
        outs = []
        for ti in range(t):
            gates = inp[:, ti] @ w_ih.T + h @ w_hh.T + b
            i_g = jax.nn.sigmoid(gates[:, :HIDDEN])
            f_g = jax.nn.sigmoid(gates[:, HIDDEN:2 * HIDDEN])
            g_g = jnp.tanh(gates[:, 2 * HIDDEN:3 * HIDDEN])
            o_g = jax.nn.sigmoid(gates[:, 3 * HIDDEN:])
            c = f_g * c + i_g * g_g
            h = o_g * jnp.tanh(c)
            outs.append(h)
        inp = jnp.stack(outs, axis=1)
        h_n.append(h)
        c_n.append(c)
    feats = inp[:, -1] if LAST_SEQ else inp
    y = feats @ params['w_fc'].T + params['b_fc']
    y = jnp.maximum(y, 0.0) + params['prelu_a'] * jnp.minimum(y, 0.0)
    return y, jnp.stack(h_n), jnp.stack(c_n)


# ======================================================================================
if __name__ == "__main__":
    params = init_params(0)
    prep = prepare_params(params)
    x = jax.random.normal(jax.random.PRNGKey(0), (N_BATCH, SEQ, INPUT_SIZE), jnp.float32)

    y, (h_n, c_n) = lstm_encoder_forward(x, prep)
    y = jax.block_until_ready(y)

    exp_y = (N_BATCH, OUTPUT_SIZE) if LAST_SEQ else (N_BATCH, SEQ, OUTPUT_SIZE)
    assert y.shape == exp_y, y.shape
    assert h_n.shape == (DEPTH, N_BATCH, HIDDEN), h_n.shape
    assert c_n.shape == (DEPTH, N_BATCH, HIDDEN), c_n.shape

    ry, rh, rc = ref_forward(x, params)
    np.testing.assert_allclose(np.asarray(y), np.asarray(ry), rtol=5e-3, atol=5e-3)
    np.testing.assert_allclose(np.asarray(h_n), np.asarray(rh), rtol=5e-3, atol=5e-3)
    np.testing.assert_allclose(np.asarray(c_n), np.asarray(rc), rtol=5e-3, atol=5e-3)

    print("KERNEL_OK")
</pallas_src>

<mosaic_0001>
module attributes {stable_mosaic.version = 11 : i64} {
  func.func @kernel(%arg0: memref<2x32xf32, #tpu.memory_space<vmem>>, %arg1: memref<4x128xf32, #tpu.memory_space<vmem>>, %arg2: memref<32x128xf32, #tpu.memory_space<vmem>>, %arg3: memref<32x128xf32, #tpu.memory_space<vmem>>, %arg4: memref<32x128xf32, #tpu.memory_space<vmem>>, %arg5: memref<1x128xf32, #tpu.memory_space<vmem>>, %arg6: memref<1x128xf32, #tpu.memory_space<vmem>>, %arg7: memref<32x128xf32, #tpu.memory_space<vmem>>, %arg8: memref<1x128xf32, #tpu.memory_space<vmem>>, %arg9: memref<1xf32, #tpu.memory_space<smem>>, %arg10: memref<2x1024xf32, #tpu.memory_space<vmem>>, %arg11: memref<2x2x32xf32, #tpu.memory_space<vmem>>, %arg12: memref<2x2x32xf32, #tpu.memory_space<vmem>>) attributes {dimension_semantics = [], scalar_prefetch = 0 : i64, scratch_operands = 0 : i64, tpu.core_type = #tpu.core_type<tc>} {
    %c0 = arith.constant 0 : index
    %c0_0 = arith.constant 0 : index
    %0 = vector.load %arg0[%c0, %c0_0] : memref<2x32xf32, #tpu.memory_space<vmem>>, vector<2x32xf32>
    %c0_1 = arith.constant 0 : index
    %c0_2 = arith.constant 0 : index
    %1 = vector.load %arg1[%c0_1, %c0_2] : memref<4x128xf32, #tpu.memory_space<vmem>>, vector<4x128xf32>
    %c0_3 = arith.constant 0 : index
    %c0_4 = arith.constant 0 : index
    %2 = vector.load %arg2[%c0_3, %c0_4] : memref<32x128xf32, #tpu.memory_space<vmem>>, vector<32x128xf32>
    %c0_5 = arith.constant 0 : index
    %c0_6 = arith.constant 0 : index
    %3 = vector.load %arg3[%c0_5, %c0_6] : memref<32x128xf32, #tpu.memory_space<vmem>>, vector<32x128xf32>
    %c0_7 = arith.constant 0 : index
    %c0_8 = arith.constant 0 : index
    %4 = vector.load %arg4[%c0_7, %c0_8] : memref<32x128xf32, #tpu.memory_space<vmem>>, vector<32x128xf32>
    %c0_9 = arith.constant 0 : index
    %c0_10 = arith.constant 0 : index
    %5 = vector.load %arg5[%c0_9, %c0_10] : memref<1x128xf32, #tpu.memory_space<vmem>>, vector<1x128xf32>
    %c0_11 = arith.constant 0 : index
    %c0_12 = arith.constant 0 : index
    %6 = vector.load %arg6[%c0_11, %c0_12] : memref<1x128xf32, #tpu.memory_space<vmem>>, vector<1x128xf32>
    %c0_13 = arith.constant 0 : index
    %c0_14 = arith.constant 0 : index
    %7 = vector.load %arg7[%c0_13, %c0_14] : memref<32x128xf32, #tpu.memory_space<vmem>>, vector<32x128xf32>
    %c0_15 = arith.constant 0 : index
    %c0_16 = arith.constant 0 : index
    %8 = vector.load %arg8[%c0_15, %c0_16] : memref<1x128xf32, #tpu.memory_space<vmem>>, vector<1x128xf32>
    %c0_17 = arith.constant 0 : index
    %9 = memref.load %arg9[%c0_17] : memref<1xf32, #tpu.memory_space<smem>>
    %10 = vector.extract_strided_slice %0 {offsets = [0, 0], sizes = [2, 4], strides = [1, 1]} : vector<2x32xf32> to vector<2x4xf32>
    %cst = arith.constant dense<0.000000e+00> : vector<2x128xf32>
    %11 = tpu.matmul %10, %1, %cst {dimension_numbers = #tpu.dot_dimension_numbers<[1], [0], [0], [1], [0, 0, 1, 1], [], []>} : vector<2x4xf32>, vector<4x128xf32>, vector<2x128xf32> -> vector<2x128xf32>
    %12 = vector.broadcast %5 : vector<1x128xf32> to vector<2x128xf32>
    %13 = arith.addf %11, %12 : vector<2x128xf32>
    %14 = vector.extract_strided_slice %0 {offsets = [0, 4], sizes = [2, 4], strides = [1, 1]} : vector<2x32xf32> to vector<2x4xf32>
    %cst_18 = arith.constant dense<0.000000e+00> : vector<2x128xf32>
    %15 = tpu.matmul %14, %1, %cst_18 {dimension_numbers = #tpu.dot_dimension_numbers<[1], [0], [0], [1], [0, 0, 1, 1], [], []>} : vector<2x4xf32>, vector<4x128xf32>, vector<2x128xf32> -> vector<2x128xf32>
    %16 = vector.broadcast %5 : vector<1x128xf32> to vector<2x128xf32>
    %17 = arith.addf %15, %16 : vector<2x128xf32>
    %18 = vector.extract_strided_slice %0 {offsets = [0, 8], sizes = [2, 4], strides = [1, 1]} : vector<2x32xf32> to vector<2x4xf32>
    %cst_19 = arith.constant dense<0.000000e+00> : vector<2x128xf32>
    %19 = tpu.matmul %18, %1, %cst_19 {dimension_numbers = #tpu.dot_dimension_numbers<[1], [0], [0], [1], [0, 0, 1, 1], [], []>} : vector<2x4xf32>, vector<4x128xf32>, vector<2x128xf32> -> vector<2x128xf32>
    %20 = vector.broadcast %5 : vector<1x128xf32> to vector<2x128xf32>
    %21 = arith.addf %19, %20 : vector<2x128xf32>
    %22 = vector.extract_strided_slice %0 {offsets = [0, 12], sizes = [2, 4], strides = [1, 1]} : vector<2x32xf32> to vector<2x4xf32>
    %cst_20 = arith.constant dense<0.000000e+00> : vector<2x128xf32>
    %23 = tpu.matmul %22, %1, %cst_20 {dimension_numbers = #tpu.dot_dimension_numbers<[1], [0], [0], [1], [0, 0, 1, 1], [], []>} : vector<2x4xf32>, vector<4x128xf32>, vector<2x128xf32> -> vector<2x128xf32>
    %24 = vector.broadcast %5 : vector<1x128xf32> to vector<2x128xf32>
    %25 = arith.addf %23, %24 : vector<2x128xf32>
    %26 = vector.extract_strided_slice %0 {offsets = [0, 16], sizes = [2, 4], strides = [1, 1]} : vector<2x32xf32> to vector<2x4xf32>
    %cst_21 = arith.constant dense<0.000000e+00> : vector<2x128xf32>
    %27 = tpu.matmul %26, %1, %cst_21 {dimension_numbers = #tpu.dot_dimension_numbers<[1], [0], [0], [1], [0, 0, 1, 1], [], []>} : vector<2x4xf32>, vector<4x128xf32>, vector<2x128xf32> -> vector<2x128xf32>
    %28 = vector.broadcast %5 : vector<1x128xf32> to vector<2x128xf32>
    %29 = arith.addf %27, %28 : vector<2x128xf32>
    %30 = vector.extract_strided_slice %0 {offsets = [0, 20], sizes = [2, 4], strides = [1, 1]} : vector<2x32xf32> to vector<2x4xf32>
    %cst_22 = arith.constant dense<0.000000e+00> : vector<2x128xf32>
    %31 = tpu.matmul %30, %1, %cst_22 {dimension_numbers = #tpu.dot_dimension_numbers<[1], [0], [0], [1], [0, 0, 1, 1], [], []>} : vector<2x4xf32>, vector<4x128xf32>, vector<2x128xf32> -> vector<2x128xf32>
    %32 = vector.broadcast %5 : vector<1x128xf32> to vector<2x128xf32>
    %33 = arith.addf %31, %32 : vector<2x128xf32>
    %34 = vector.extract_strided_slice %0 {offsets = [0, 24], sizes = [2, 4], strides = [1, 1]} : vector<2x32xf32> to vector<2x4xf32>
    %cst_23 = arith.constant dense<0.000000e+00> : vector<2x128xf32>
    %35 = tpu.matmul %34, %1, %cst_23 {dimension_numbers = #tpu.dot_dimension_numbers<[1], [0], [0], [1], [0, 0, 1, 1], [], []>} : vector<2x4xf32>, vector<4x128xf32>, vector<2x128xf32> -> vector<2x128xf32>
    %36 = vector.broadcast %5 : vector<1x128xf32> to vector<2x128xf32>
    %37 = arith.addf %35, %36 : vector<2x128xf32>
    %38 = vector.extract_strided_slice %0 {offsets = [0, 28], sizes = [2, 4], strides = [1, 1]} : vector<2x32xf32> to vector<2x4xf32>
    %cst_24 = arith.constant dense<0.000000e+00> : vector<2x128xf32>
    %39 = tpu.matmul %38, %1, %cst_24 {dimension_numbers = #tpu.dot_dimension_numbers<[1], [0], [0], [1], [0, 0, 1, 1], [], []>} : vector<2x4xf32>, vector<4x128xf32>, vector<2x128xf32> -> vector<2x128xf32>
    %40 = vector.broadcast %5 : vector<1x128xf32> to vector<2x128xf32>
    %41 = arith.addf %39, %40 : vector<2x128xf32>
    %42 = math.tanh %13 : vector<2x128xf32>
    %43 = vector.extract_strided_slice %42 {offsets = [0, 0], sizes = [2, 32], strides = [1, 1]} : vector<2x128xf32> to vector<2x32xf32>
    %cst_25 = arith.constant 5.000000e-01 : f32
    %44 = vector.broadcast %cst_25 : f32 to vector<2x32xf32>
    %45 = arith.mulf %44, %43 : vector<2x32xf32>
    %cst_26 = arith.constant 5.000000e-01 : f32
    %46 = vector.broadcast %cst_26 : f32 to vector<2x32xf32>
    %47 = arith.addf %45, %46 : vector<2x32xf32>
    %48 = vector.extract_strided_slice %42 {offsets = [0, 64], sizes = [2, 32], strides = [1, 1]} : vector<2x128xf32> to vector<2x32xf32>
    %49 = vector.extract_strided_slice %42 {offsets = [0, 96], sizes = [2, 32], strides = [1, 1]} : vector<2x128xf32> to vector<2x32xf32>
    %cst_27 = arith.constant 5.000000e-01 : f32
    %50 = vector.broadcast %cst_27 : f32 to vector<2x32xf32>
    %51 = arith.mulf %50, %49 : vector<2x32xf32>
    %cst_28 = arith.constant 5.000000e-01 : f32
    %52 = vector.broadcast %cst_28 : f32 to vector<2x32xf32>
    %53 = arith.addf %51, %52 : vector<2x32xf32>
    %54 = arith.mulf %47, %48 : vector<2x32xf32>
    %55 = math.tanh %54 : vector<2x32xf32>
    %56 = arith.mulf %53, %55 : vector<2x32xf32>
    %cst_29 = arith.constant dense<0.000000e+00> : vector<2x128xf32>
    %57 = tpu.matmul %56, %2, %cst_29 {dimension_numbers = #tpu.dot_dimension_numbers<[1], [0], [0], [1], [0, 0, 1, 1], [], []>} : vector<2x32xf32>, vector<32x128xf32>, vector<2x128xf32> -> vector<2x128xf32>
    %58 = vector.broadcast %6 : vector<1x128xf32> to vector<2x128xf32>
    %59 = arith.addf %57, %58 : vector<2x128xf32>
    %60 = math.tanh %59 : vector<2x128xf32>
    %61 = vector.extract_strided_slice %60 {offsets = [0, 0], sizes = [2, 32], strides = [1, 1]} : vector<2x128xf32> to vector<2x32xf32>
    %cst_30 = arith.constant 5.000000e-01 : f32
    %62 = vector.broadcast %cst_30 : f32 to vector<2x32xf32>
    %63 = arith.mulf %62, %61 : vector<2x32xf32>
    %cst_31 = arith.constant 5.000000e-01 : f32
    %64 = vector.broadcast %cst_31 : f32 to vector<2x32xf32>
    %65 = arith.addf %63, %64 : vector<2x32xf32>
    %66 = vector.extract_strided_slice %60 {offsets = [0, 64], sizes = [2, 32], strides = [1, 1]} : vector<2x128xf32> to vector<2x32xf32>
    %67 = vector.extract_strided_slice %60 {offsets = [0, 96], sizes = [2, 32], strides = [1, 1]} : vector<2x128xf32> to vector<2x32xf32>
    %cst_32 = arith.constant 5.000000e-01 : f32
    %68 = vector.broadcast %cst_32 : f32 to vector<2x32xf32>
    %69 = arith.mulf %68, %67 : vector<2x32xf32>
    %cst_33 = arith.constant 5.000000e-01 : f32
    %70 = vector.broadcast %cst_33 : f32 to vector<2x32xf32>
    %71 = arith.addf %69, %70 : vector<2x32xf32>
    %72 = arith.mulf %65, %66 : vector<2x32xf32>
    %73 = math.tanh %72 : vector<2x32xf32>
    %74 = arith.mulf %71, %73 : vector<2x32xf32>
    %cst_34 = arith.constant dense<0.000000e+00> : vector<2x128xf32>
    %75 = tpu.matmul %74, %7, %cst_34 {dimension_numbers = #tpu.dot_dimension_numbers<[1], [0], [0], [1], [0, 0, 1, 1], [], []>} : vector<2x32xf32>, vector<32x128xf32>, vector<2x128xf32> -> vector<2x128xf32>
    %76 = vector.broadcast %8 : vector<1x128xf32> to vector<2x128xf32>
    %77 = arith.addf %75, %76 : vector<2x128xf32>
    %cst_35 = arith.constant 0.000000e+00 : f32
    %78 = vector.broadcast %cst_35 : f32 to vector<2x128xf32>
    %79 = arith.maximumf %77, %78 : vector<2x128xf32>
    %cst_36 = arith.constant 0.000000e+00 : f32
    %80 = vector.broadcast %cst_36 : f32 to vector<2x128xf32>
    %81 = arith.minimumf %77, %80 : vector<2x128xf32>
    %82 = vector.broadcast %9 : f32 to vector<2x128xf32>
    %83 = arith.mulf %82, %81 : vector<2x128xf32>
    %84 = arith.addf %79, %83 : vector<2x128xf32>
    %c0_37 = arith.constant 0 : index
    %c0_38 = arith.constant 0 : index
    %85 = vector.load %arg10[%c0_37, %c0_38] : memref<2x1024xf32, #tpu.memory_space<vmem>>, vector<2x128xf32>
    tpu.vector_store %arg10[%c0_37, %c0_38], %84 {strides = array<i32>} : memref<2x1024xf32, #tpu.memory_space<vmem>>, vector<2x128xf32>,
    %cst_39 = arith.constant dense<0.000000e+00> : vector<2x128xf32>
    %86 = tpu.matmul %56, %3, %cst_39 {dimension_numbers = #tpu.dot_dimension_numbers<[1], [0], [0], [1], [0, 0, 1, 1], [], []>} : vector<2x32xf32>, vector<32x128xf32>, vector<2x128xf32> -> vector<2x128xf32>
    %87 = arith.addf %17, %86 : vector<2x128xf32>
    %88 = math.tanh %87 : vector<2x128xf32>
    %89 = vector.extract_strided_slice %88 {offsets = [0, 0], sizes = [2, 32], strides = [1, 1]} : vector<2x128xf32> to vector<2x32xf32>
    %cst_40 = arith.constant 5.000000e-01 : f32
    %90 = vector.broadcast %cst_40 : f32 to vector<2x32xf32>
    %91 = arith.mulf %90, %89 : vector<2x32xf32>
    %cst_41 = arith.constant 5.000000e-01 : f32
    %92 = vector.broadcast %cst_41 : f32 to vector<2x32xf32>
    %93 = arith.addf %91, %92 : vector<2x32xf32>
    %94 = vector.extract_strided_slice %88 {offsets = [0, 32], sizes = [2, 32], strides = [1, 1]} : vector<2x128xf32> to vector<2x32xf32>
    %cst_42 = arith.constant 5.000000e-01 : f32
    %95 = vector.broadcast %cst_42 : f32 to vector<2x32xf32>
    %96 = arith.mulf %95, %94 : vector<2x32xf32>
    %cst_43 = arith.constant 5.000000e-01 : f32
    %97 = vector.broadcast %cst_43 : f32 to vector<2x32xf32>
    %98 = arith.addf %96, %97 : vector<2x32xf32>
    %99 = vector.extract_strided_slice %88 {offsets = [0, 64], sizes = [2, 32], strides = [1, 1]} : vector<2x128xf32> to vector<2x32xf32>
    %100 = vector.extract_strided_slice %88 {offsets = [0, 96], sizes = [2, 32], strides = [1, 1]} : vector<2x128xf32> to vector<2x32xf32>
    %cst_44 = arith.constant 5.000000e-01 : f32
    %101 = vector.broadcast %cst_44 : f32 to vector<2x32xf32>
    %102 = arith.mulf %101, %100 : vector<2x32xf32>
    %cst_45 = arith.constant 5.000000e-01 : f32
    %103 = vector.broadcast %cst_45 : f32 to vector<2x32xf32>
    %104 = arith.addf %102, %103 : vector<2x32xf32>
    %105 = arith.mulf %98, %54 : vector<2x32xf32>
    %106 = arith.mulf %93, %99 : vector<2x32xf32>
    %107 = arith.addf %105, %106 : vector<2x32xf32>
    %108 = math.tanh %107 : vector<2x32xf32>
    %109 = arith.mulf %104, %108 : vector<2x32xf32>
    %cst_46 = arith.constant dense<0.000000e+00> : vector<2x128xf32>
    %110 = tpu.matmul %109, %2, %cst_46 {dimension_numbers = #tpu.dot_dimension_numbers<[1], [0], [0], [1], [0, 0, 1, 1], [], []>} : vector<2x32xf32>, vector<32x128xf32>, vector<2x128xf32> -> vector<2x128xf32>
    %111 = vector.broadcast %6 : vector<1x128xf32> to vector<2x128xf32>
    %112 = arith.addf %110, %111 : vector<2x128xf32>
    %cst_47 = arith.constant dense<0.000000e+00> : vector<2x128xf32>
    %113 = tpu.matmul %74, %4, %cst_47 {dimension_numbers = #tpu.dot_dimension_numbers<[1], [0], [0], [1], [0, 0, 1, 1], [], []>} : vector<2x32xf32>, vector<32x128xf32>, vector<2x128xf32> -> vector<2x128xf32>
    %114 = arith.addf %112, %113 : vector<2x128xf32>
    %115 = math.tanh %114 : vector<2x128xf32>
    %116 = vector.extract_strided_slice %115 {offsets = [0, 0], sizes = [2, 32], strides = [1, 1]} : vector<2x128xf32> to vector<2x32xf32>
    %cst_48 = arith.constant 5.000000e-01 : f32
    %117 = vector.broadcast %cst_48 : f32 to vector<2x32xf32>
    %118 = arith.mulf %117, %116 : vector<2x32xf32>
    %cst_49 = arith.constant 5.000000e-01 : f32
    %119 = vector.broadcast %cst_49 : f32 to vector<2x32xf32>
    %120 = arith.addf %118, %119 : vector<2x32xf32>
    %121 = vector.extract_strided_slice %115 {offsets = [0, 32], sizes = [2, 32], strides = [1, 1]} : vector<2x128xf32> to vector<2x32xf32>
    %cst_50 = arith.constant 5.000000e-01 : f32
    %122 = vector.broadcast %cst_50 : f32 to vector<2x32xf32>
    %123 = arith.mulf %122, %121 : vector<2x32xf32>
    %cst_51 = arith.constant 5.000000e-01 : f32
    %124 = vector.broadcast %cst_51 : f32 to vector<2x32xf32>
    %125 = arith.addf %123, %124 : vector<2x32xf32>
    %126 = vector.extract_strided_slice %115 {offsets = [0, 64], sizes = [2, 32], strides = [1, 1]} : vector<2x128xf32> to vector<2x32xf32>
    %127 = vector.extract_strided_slice %115 {offsets = [0, 96], sizes = [2, 32], strides = [1, 1]} : vector<2x128xf32> to vector<2x32xf32>
    %cst_52 = arith.constant 5.000000e-01 : f32
    %128 = vector.broadcast %cst_52 : f32 to vector<2x32xf32>
    %129 = arith.mulf %128, %127 : vector<2x32xf32>
    %cst_53 = arith.constant 5.000000e-01 : f32
    %130 = vector.broadcast %cst_53 : f32 to vector<2x32xf32>
    %131 = arith.addf %129, %130 : vector<2x32xf32>
    %132 = arith.mulf %125, %72 : vector<2x32xf32>
    %133 = arith.mulf %120, %126 : vector<2x32xf32>
    %134 = arith.addf %132, %133 : vector<2x32xf32>
    %135 = math.tanh %134 : vector<2x32xf32>
    %136 = arith.mulf %131, %135 : vector<2x32xf32>
    %cst_54 = arith.constant dense<0.000000e+00> : vector<2x128xf32>
    %137 = tpu.matmul %136, %7, %cst_54 {dimension_numbers = #tpu.dot_dimension_numbers<[1], [0], [0], [1], [0, 0, 1, 1], [], []>} : vector<2x32xf32>, vector<32x128xf32>, vector<2x128xf32> -> vector<2x128xf32>
    %138 = vector.broadcast %8 : vector<1x128xf32> to vector<2x128xf32>
    %139 = arith.addf %137, %138 : vector<2x128xf32>
    %cst_55 = arith.constant 0.000000e+00 : f32
    %140 = vector.broadcast %cst_55 : f32 to vector<2x128xf32>
    %141 = arith.maximumf %139, %140 : vector<2x128xf32>
    %cst_56 = arith.constant 0.000000e+00 : f32
    %142 = vector.broadcast %cst_56 : f32 to vector<2x128xf32>
    %143 = arith.minimumf %139, %142 : vector<2x128xf32>
    %144 = vector.broadcast %9 : f32 to vector<2x128xf32>
    %145 = arith.mulf %144, %143 : vector<2x128xf32>
    %146 = arith.addf %141, %145 : vector<2x128xf32>
    %c0_57 = arith.constant 0 : index
    %c128 = arith.constant 128 : index
    %147 = vector.load %arg10[%c0_57, %c128] : memref<2x1024xf32, #tpu.memory_space<vmem>>, vector<2x128xf32>
    tpu.vector_store %arg10[%c0_57, %c128], %146 {strides = array<i32>} : memref<2x1024xf32, #tpu.memory_space<vmem>>, vector<2x128xf32>,
    %cst_58 = arith.constant dense<0.000000e+00> : vector<2x128xf32>
    %148 = tpu.matmul %109, %3, %cst_58 {dimension_numbers = #tpu.dot_dimension_numbers<[1], [0], [0], [1], [0, 0, 1, 1], [], []>} : vector<2x32xf32>, vector<32x128xf32>, vector<2x128xf32> -> vector<2x128xf32>
    %149 = arith.addf %21, %148 : vector<2x128xf32>
    %150 = math.tanh %149 : vector<2x128xf32>
    %151 = vector.extract_strided_slice %150 {offsets = [0, 0], sizes = [2, 32], strides = [1, 1]} : vector<2x128xf32> to vector<2x32xf32>
    %cst_59 = arith.constant 5.000000e-01 : f32
    %152 = vector.broadcast %cst_59 : f32 to vector<2x32xf32>
    %153 = arith.mulf %152, %151 : vector<2x32xf32>
    %cst_60 = arith.constant 5.000000e-01 : f32
    %154 = vector.broadcast %cst_60 : f32 to vector<2x32xf32>
    %155 = arith.addf %153, %154 : vector<2x32xf32>
    %156 = vector.extract_strided_slice %150 {offsets = [0, 32], sizes = [2, 32], strides = [1, 1]} : vector<2x128xf32> to vector<2x32xf32>
    %cst_61 = arith.constant 5.000000e-01 : f32
    %157 = vector.broadcast %cst_61 : f32 to vector<2x32xf32>
    %158 = arith.mulf %157, %156 : vector<2x32xf32>
    %cst_62 = arith.constant 5.000000e-01 : f32
    %159 = vector.broadcast %cst_62 : f32 to vector<2x32xf32>
    %160 = arith.addf %158, %159 : vector<2x32xf32>
    %161 = vector.extract_strided_slice %150 {offsets = [0, 64], sizes = [2, 32], strides = [1, 1]} : vector<2x128xf32> to vector<2x32xf32>
    %162 = vector.extract_strided_slice %150 {offsets = [0, 96], sizes = [2, 32], strides = [1, 1]} : vector<2x128xf32> to vector<2x32xf32>
    %cst_63 = arith.constant 5.000000e-01 : f32
    %163 = vector.broadcast %cst_63 : f32 to vector<2x32xf32>
    %164 = arith.mulf %163, %162 : vector<2x32xf32>
    %cst_64 = arith.constant 5.000000e-01 : f32
    %165 = vector.broadcast %cst_64 : f32 to vector<2x32xf32>
    %166 = arith.addf %164, %165 : vector<2x32xf32>
    %167 = arith.mulf %160, %107 : vector<2x32xf32>
    %168 = arith.mulf %155, %161 : vector<2x32xf32>
    %169 = arith.addf %167, %168 : vector<2x32xf32>
    %170 = math.tanh %169 : vector<2x32xf32>
    %171 = arith.mulf %166, %170 : vector<2x32xf32>
    %cst_65 = arith.constant dense<0.000000e+00> : vector<2x128xf32>
    %172 = tpu.matmul %171, %2, %cst_65 {dimension_numbers = #tpu.dot_dimension_numbers<[1], [0], [0], [1], [0, 0, 1, 1], [], []>} : vector<2x32xf32>, vector<32x128xf32>, vector<2x128xf32> -> vector<2x128xf32>
    %173 = vector.broadcast %6 : vector<1x128xf32> to vector<2x128xf32>
    %174 = arith.addf %172, %173 : vector<2x128xf32>
    %cst_66 = arith.constant dense<0.000000e+00> : vector<2x128xf32>
    %175 = tpu.matmul %136, %4, %cst_66 {dimension_numbers = #tpu.dot_dimension_numbers<[1], [0], [0], [1], [0, 0, 1, 1], [], []>} : vector<2x32xf32>, vector<32x128xf32>, vector<2x128xf32> -> vector<2x128xf32>
    %176 = arith.addf %174, %175 : vector<2x128xf32>
    %177 = math.tanh %176 : vector<2x128xf32>
    %178 = vector.extract_strided_slice %177 {offsets = [0, 0], sizes = [2, 32], strides = [1, 1]} : vector<2x128xf32> to vector<2x32xf32>
    %cst_67 = arith.constant 5.000000e-01 : f32
    %179 = vector.broadcast %cst_67 : f32 to vector<2x32xf32>
    %180 = arith.mulf %179, %178 : vector<2x32xf32>
    %cst_68 = arith.constant 5.000000e-01 : f32
    %181 = vector.broadcast %cst_68 : f32 to vector<2x32xf32>
    %182 = arith.addf %180, %181 : vector<2x32xf32>
    %183 = vector.extract_strided_slice %177 {offsets = [0, 32], sizes = [2, 32], strides = [1, 1]} : vector<2x128xf32> to vector<2x32xf32>
    %cst_69 = arith.constant 5.000000e-01 : f32
    %184 = vector.broadcast %cst_69 : f32 to vector<2x32xf32>
    %185 = arith.mulf %184, %183 : vector<2x32xf32>
    %cst_70 = arith.constant 5.000000e-01 : f32
    %186 = vector.broadcast %cst_70 : f32 to vector<2x32xf32>
    %187 = arith.addf %185, %186 : vector<2x32xf32>
    %188 = vector.extract_strided_slice %177 {offsets = [0, 64], sizes = [2, 32], strides = [1, 1]} : vector<2x128xf32> to vector<2x32xf32>
    %189 = vector.extract_strided_slice %177 {offsets = [0, 96], sizes = [2, 32], strides = [1, 1]} : vector<2x128xf32> to vector<2x32xf32>
    %cst_71 = arith.constant 5.000000e-01 : f32
    %190 = vector.broadcast %cst_71 : f32 to vector<2x32xf32>
    %191 = arith.mulf %190, %189 : vector<2x32xf32>
    %cst_72 = arith.constant 5.000000e-01 : f32
    %192 = vector.broadcast %cst_72 : f32 to vector<2x32xf32>
    %193 = arith.addf %191, %192 : vector<2x32xf32>
    %194 = arith.mulf %187, %134 : vector<2x32xf32>
    %195 = arith.mulf %182, %188 : vector<2x32xf32>
    %196 = arith.addf %194, %195 : vector<2x32xf32>
    %197 = math.tanh %196 : vector<2x32xf32>
    %198 = arith.mulf %193, %197 : vector<2x32xf32>
    %cst_73 = arith.constant dense<0.000000e+00> : vector<2x128xf32>
    %199 = tpu.matmul %198, %7, %cst_73 {dimension_numbers = #tpu.dot_dimension_numbers<[1], [0], [0], [1], [0, 0, 1, 1], [], []>} : vector<2x32xf32>, vector<32x128xf32>, vector<2x128xf32> -> vector<2x128xf32>
    %200 = vector.broadcast %8 : vector<1x128xf32> to vector<2x128xf32>
    %201 = arith.addf %199, %200 : vector<2x128xf32>
    %cst_74 = arith.constant 0.000000e+00 : f32
    %202 = vector.broadcast %cst_74 : f32 to vector<2x128xf32>
    %203 = arith.maximumf %201, %202 : vector<2x128xf32>
    %cst_75 = arith.constant 0.000000e+00 : f32
    %204 = vector.broadcast %cst_75 : f32 to vector<2x128xf32>
    %205 = arith.minimumf %201, %204 : vector<2x128xf32>
    %206 = vector.broadcast %9 : f32 to vector<2x128xf32>
    %207 = arith.mulf %206, %205 : vector<2x128xf32>
    %208 = arith.addf %203, %207 : vector<2x128xf32>
    %c0_76 = arith.constant 0 : index
    %c256 = arith.constant 256 : index
    %209 = vector.load %arg10[%c0_76, %c256] : memref<2x1024xf32, #tpu.memory_space<vmem>>, vector<2x128xf32>
    tpu.vector_store %arg10[%c0_76, %c256], %208 {strides = array<i32>} : memref<2x1024xf32, #tpu.memory_space<vmem>>, vector<2x128xf32>,
    %cst_77 = arith.constant dense<0.000000e+00> : vector<2x128xf32>
    %210 = tpu.matmul %171, %3, %cst_77 {dimension_numbers = #tpu.dot_dimension_numbers<[1], [0], [0], [1], [0, 0, 1, 1], [], []>} : vector<2x32xf32>, vector<32x128xf32>, vector<2x128xf32> -> vector<2x128xf32>
    %211 = arith.addf %25, %210 : vector<2x128xf32>
    %212 = math.tanh %211 : vector<2x128xf32>
    %213 = vector.extract_strided_slice %212 {offsets = [0, 0], sizes = [2, 32], strides = [1, 1]} : vector<2x128xf32> to vector<2x32xf32>
    %cst_78 = arith.constant 5.000000e-01 : f32
    %214 = vector.broadcast %cst_78 : f32 to vector<2x32xf32>
    %215 = arith.mulf %214, %213 : vector<2x32xf32>
    %cst_79 = arith.constant 5.000000e-01 : f32
    %216 = vector.broadcast %cst_79 : f32 to vector<2x32xf32>
    %217 = arith.addf %215, %216 : vector<2x32xf32>
    %218 = vector.extract_strided_slice %212 {offsets = [0, 32], sizes = [2, 32], strides = [1, 1]} : vector<2x128xf32> to vector<2x32xf32>
    %cst_80 = arith.constant 5.000000e-01 : f32
    %219 = vector.broadcast %cst_80 : f32 to vector<2x32xf32>
    %220 = arith.mulf %219, %218 : vector<2x32xf32>
    %cst_81 = arith.constant 5.000000e-01 : f32
    %221 = vector.broadcast %cst_81 : f32 to vector<2x32xf32>
    %222 = arith.addf %220, %221 : vector<2x32xf32>
    %223 = vector.extract_strided_slice %212 {offsets = [0, 64], sizes = [2, 32], strides = [1, 1]} : vector<2x128xf32> to vector<2x32xf32>
    %224 = vector.extract_strided_slice %212 {offsets = [0, 96], sizes = [2, 32], strides = [1, 1]} : vector<2x128xf32> to vector<2x32xf32>
    %cst_82 = arith.constant 5.000000e-01 : f32
    %225 = vector.broadcast %cst_82 : f32 to vector<2x32xf32>
    %226 = arith.mulf %225, %224 : vector<2x32xf32>
    %cst_83 = arith.constant 5.000000e-01 : f32
    %227 = vector.broadcast %cst_83 : f32 to vector<2x32xf32>
    %228 = arith.addf %226, %227 : vector<2x32xf32>
    %229 = arith.mulf %222, %169 : vector<2x32xf32>
    %230 = arith.mulf %217, %223 : vector<2x32xf32>
    %231 = arith.addf %229, %230 : vector<2x32xf32>
    %232 = math.tanh %231 : vector<2x32xf32>
    %233 = arith.mulf %228, %232 : vector<2x32xf32>
    %cst_84 = arith.constant dense<0.000000e+00> : vector<2x128xf32>
    %234 = tpu.matmul %233, %2, %cst_84 {dimension_numbers = #tpu.dot_dimension_numbers<[1], [0], [0], [1], [0, 0, 1, 1], [], []>} : vector<2x32xf32>, vector<32x128xf32>, vector<2x128xf32> -> vector<2x128xf32>
    %235 = vector.broadcast %6 : vector<1x128xf32> to vector<2x128xf32>
    %236 = arith.addf %234, %235 : vector<2x128xf32>
    %cst_85 = arith.constant dense<0.000000e+00> : vector<2x128xf32>
    %237 = tpu.matmul %198, %4, %cst_85 {dimension_numbers = #tpu.dot_dimension_numbers<[1], [0], [0], [1], [0, 0, 1, 1], [], []>} : vector<2x32xf32>, vector<32x128xf32>, vector<2x128xf32> -> vector<2x128xf32>
    %238 = arith.addf %236, %237 : vector<2x128xf32>
    %239 = math.tanh %238 : vector<2x128xf32>
    %240 = vector.extract_strided_slice %239 {offsets = [0, 0], sizes = [2, 32], strides = [1, 1]} : vector<2x128xf32> to vector<2x32xf32>
    %cst_86 = arith.constant 5.000000e-01 : f32
    %241 = vector.broadcast %cst_86 : f32 to vector<2x32xf32>
    %242 = arith.mulf %241, %240 : vector<2x32xf32>
    %cst_87 = arith.constant 5.000000e-01 : f32
    %243 = vector.broadcast %cst_87 : f32 to vector<2x32xf32>
    %244 = arith.addf %242, %243 : vector<2x32xf32>
    %245 = vector.extract_strided_slice %239 {offsets = [0, 32], sizes = [2, 32], strides = [1, 1]} : vector<2x128xf32> to vector<2x32xf32>
    %cst_88 = arith.constant 5.000000e-01 : f32
    %246 = vector.broadcast %cst_88 : f32 to vector<2x32xf32>
    %247 = arith.mulf %246, %245 : vector<2x32xf32>
    %cst_89 = arith.constant 5.000000e-01 : f32
    %248 = vector.broadcast %cst_89 : f32 to vector<2x32xf32>
    %249 = arith.addf %247, %248 : vector<2x32xf32>
    %250 = vector.extract_strided_slice %239 {offsets = [0, 64], sizes = [2, 32], strides = [1, 1]} : vector<2x128xf32> to vector<2x32xf32>
    %251 = vector.extract_strided_slice %239 {offsets = [0, 96], sizes = [2, 32], strides = [1, 1]} : vector<2x128xf32> to vector<2x32xf32>
    %cst_90 = arith.constant 5.000000e-01 : f32
    %252 = vector.broadcast %cst_90 : f32 to vector<2x32xf32>
    %253 = arith.mulf %252, %251 : vector<2x32xf32>
    %cst_91 = arith.constant 5.000000e-01 : f32
    %254 = vector.broadcast %cst_91 : f32 to vector<2x32xf32>
    %255 = arith.addf %253, %254 : vector<2x32xf32>
    %256 = arith.mulf %249, %196 : vector<2x32xf32>
    %257 = arith.mulf %244, %250 : vector<2x32xf32>
    %258 = arith.addf %256, %257 : vector<2x32xf32>
    %259 = math.tanh %258 : vector<2x32xf32>
    %260 = arith.mulf %255, %259 : vector<2x32xf32>
    %cst_92 = arith.constant dense<0.000000e+00> : vector<2x128xf32>
    %261 = tpu.matmul %260, %7, %cst_92 {dimension_numbers = #tpu.dot_dimension_numbers<[1], [0], [0], [1], [0, 0, 1, 1], [], []>} : vector<2x32xf32>, vector<32x128xf32>, vector<2x128xf32> -> vector<2x128xf32>
    %262 = vector.broadcast %8 : vector<1x128xf32> to vector<2x128xf32>
    %263 = arith.addf %261, %262 : vector<2x128xf32>
    %cst_93 = arith.constant 0.000000e+00 : f32
    %264 = vector.broadcast %cst_93 : f32 to vector<2x128xf32>
    %265 = arith.maximumf %263, %264 : vector<2x128xf32>
    %cst_94 = arith.constant 0.000000e+00 : f32
    %266 = vector.broadcast %cst_94 : f32 to vector<2x128xf32>
    %267 = arith.minimumf %263, %266 : vector<2x128xf32>
    %268 = vector.broadcast %9 : f32 to vector<2x128xf32>
    %269 = arith.mulf %268, %267 : vector<2x128xf32>
    %270 = arith.addf %265, %269 : vector<2x128xf32>
    %c0_95 = arith.constant 0 : index
    %c384 = arith.constant 384 : index
    %271 = vector.load %arg10[%c0_95, %c384] : memref<2x1024xf32, #tpu.memory_space<vmem>>, vector<2x128xf32>
    tpu.vector_store %arg10[%c0_95, %c384], %270 {strides = array<i32>} : memref<2x1024xf32, #tpu.memory_space<vmem>>, vector<2x128xf32>,
    %cst_96 = arith.constant dense<0.000000e+00> : vector<2x128xf32>
    %272 = tpu.matmul %233, %3, %cst_96 {dimension_numbers = #tpu.dot_dimension_numbers<[1], [0], [0], [1], [0, 0, 1, 1], [], []>} : vector<2x32xf32>, vector<32x128xf32>, vector<2x128xf32> -> vector<2x128xf32>
    %273 = arith.addf %29, %272 : vector<2x128xf32>
    %274 = math.tanh %273 : vector<2x128xf32>
    %275 = vector.extract_strided_slice %274 {offsets = [0, 0], sizes = [2, 32], strides = [1, 1]} : vector<2x128xf32> to vector<2x32xf32>
    %cst_97 = arith.constant 5.000000e-01 : f32
    %276 = vector.broadcast %cst_97 : f32 to vector<2x32xf32>
    %277 = arith.mulf %276, %275 : vector<2x32xf32>
    %cst_98 = arith.constant 5.000000e-01 : f32
    %278 = vector.broadcast %cst_98 : f32 to vector<2x32xf32>
    %279 = arith.addf %277, %278 : vector<2x32xf32>
    %280 = vector.extract_strided_slice %274 {offsets = [0, 32], sizes = [2, 32], strides = [1, 1]} : vector<2x128xf32> to vector<2x32xf32>
    %cst_99 = arith.constant 5.000000e-01 : f32
    %281 = vector.broadcast %cst_99 : f32 to vector<2x32xf32>
    %282 = arith.mulf %281, %280 : vector<2x32xf32>
    %cst_100 = arith.constant 5.000000e-01 : f32
    %283 = vector.broadcast %cst_100 : f32 to vector<2x32xf32>
    %284 = arith.addf %282, %283 : vector<2x32xf32>
    %285 = vector.extract_strided_slice %274 {offsets = [0, 64], sizes = [2, 32], strides = [1, 1]} : vector<2x128xf32> to vector<2x32xf32>
    %286 = vector.extract_strided_slice %274 {offsets = [0, 96], sizes = [2, 32], strides = [1, 1]} : vector<2x128xf32> to vector<2x32xf32>
    %cst_101 = arith.constant 5.000000e-01 : f32
    %287 = vector.broadcast %cst_101 : f32 to vector<2x32xf32>
    %288 = arith.mulf %287, %286 : vector<2x32xf32>
    %cst_102 = arith.constant 5.000000e-01 : f32
    %289 = vector.broadcast %cst_102 : f32 to vector<2x32xf32>
    %290 = arith.addf %288, %289 : vector<2x32xf32>
    %291 = arith.mulf %284, %231 : vector<2x32xf32>
    %292 = arith.mulf %279, %285 : vector<2x32xf32>
    %293 = arith.addf %291, %292 : vector<2x32xf32>
    %294 = math.tanh %293 : vector<2x32xf32>
    %295 = arith.mulf %290, %294 : vector<2x32xf32>
    %cst_103 = arith.constant dense<0.000000e+00> : vector<2x128xf32>
    %296 = tpu.matmul %295, %2, %cst_103 {dimension_numbers = #tpu.dot_dimension_numbers<[1], [0], [0], [1], [0, 0, 1, 1], [], []>} : vector<2x32xf32>, vector<32x128xf32>, vector<2x128xf32> -> vector<2x128xf32>
    %297 = vector.broadcast %6 : vector<1x128xf32> to vector<2x128xf32>
    %298 = arith.addf %296, %297 : vector<2x128xf32>
    %cst_104 = arith.constant dense<0.000000e+00> : vector<2x128xf32>
    %299 = tpu.matmul %260, %4, %cst_104 {dimension_numbers = #tpu.dot_dimension_numbers<[1], [0], [0], [1], [0, 0, 1, 1], [], []>} : vector<2x32xf32>, vector<32x128xf32>, vector<2x128xf32> -> vector<2x128xf32>
    %300 = arith.addf %298, %299 : vector<2x128xf32>
    %301 = math.tanh %300 : vector<2x128xf32>
    %302 = vector.extract_strided_slice %301 {offsets = [0, 0], sizes = [2, 32], strides = [1, 1]} : vector<2x128xf32> to vector<2x32xf32>
    %cst_105 = arith.constant 5.000000e-01 : f32
    %303 = vector.broadcast %cst_105 : f32 to vector<2x32xf32>
    %304 = arith.mulf %303, %302 : vector<2x32xf32>
    %cst_106 = arith.constant 5.000000e-01 : f32
    %305 = vector.broadcast %cst_106 : f32 to vector<2x32xf32>
    %306 = arith.addf %304, %305 : vector<2x32xf32>
    %307 = vector.extract_strided_slice %301 {offsets = [0, 32], sizes = [2, 32], strides = [1, 1]} : vector<2x128xf32> to vector<2x32xf32>
    %cst_107 = arith.constant 5.000000e-01 : f32
    %308 = vector.broadcast %cst_107 : f32 to vector<2x32xf32>
    %309 = arith.mulf %308, %307 : vector<2x32xf32>
    %cst_108 = arith.constant 5.000000e-01 : f32
    %310 = vector.broadcast %cst_108 : f32 to vector<2x32xf32>
    %311 = arith.addf %309, %310 : vector<2x32xf32>
    %312 = vector.extract_strided_slice %301 {offsets = [0, 64], sizes = [2, 32], strides = [1, 1]} : vector<2x128xf32> to vector<2x32xf32>
    %313 = vector.extract_strided_slice %301 {offsets = [0, 96], sizes = [2, 32], strides = [1, 1]} : vector<2x128xf32> to vector<2x32xf32>
    %cst_109 = arith.constant 5.000000e-01 : f32
    %314 = vector.broadcast %cst_109 : f32 to vector<2x32xf32>
    %315 = arith.mulf %314, %313 : vector<2x32xf32>
    %cst_110 = arith.constant 5.000000e-01 : f32
    %316 = vector.broadcast %cst_110 : f32 to vector<2x32xf32>
    %317 = arith.addf %315, %316 : vector<2x32xf32>
    %318 = arith.mulf %311, %258 : vector<2x32xf32>
    %319 = arith.mulf %306, %312 : vector<2x32xf32>
    %320 = arith.addf %318, %319 : vector<2x32xf32>
    %321 = math.tanh %320 : vector<2x32xf32>
    %322 = arith.mulf %317, %321 : vector<2x32xf32>
    %cst_111 = arith.constant dense<0.000000e+00> : vector<2x128xf32>
    %323 = tpu.matmul %322, %7, %cst_111 {dimension_numbers = #tpu.dot_dimension_numbers<[1], [0], [0], [1], [0, 0, 1, 1], [], []>} : vector<2x32xf32>, vector<32x128xf32>, vector<2x128xf32> -> vector<2x128xf32>
    %324 = vector.broadcast %8 : vector<1x128xf32> to vector<2x128xf32>
    %325 = arith.addf %323, %324 : vector<2x128xf32>
    %cst_112 = arith.constant 0.000000e+00 : f32
    %326 = vector.broadcast %cst_112 : f32 to vector<2x128xf32>
    %327 = arith.maximumf %325, %326 : vector<2x128xf32>
    %cst_113 = arith.constant 0.000000e+00 : f32
    %328 = vector.broadcast %cst_113 : f32 to vector<2x128xf32>
    %329 = arith.minimumf %325, %328 : vector<2x128xf32>
    %330 = vector.broadcast %9 : f32 to vector<2x128xf32>
    %331 = arith.mulf %330, %329 : vector<2x128xf32>
    %332 = arith.addf %327, %331 : vector<2x128xf32>
    %c0_114 = arith.constant 0 : index
    %c512 = arith.constant 512 : index
    %333 = vector.load %arg10[%c0_114, %c512] : memref<2x1024xf32, #tpu.memory_space<vmem>>, vector<2x128xf32>
    tpu.vector_store %arg10[%c0_114, %c512], %332 {strides = array<i32>} : memref<2x1024xf32, #tpu.memory_space<vmem>>, vector<2x128xf32>,
    %cst_115 = arith.constant dense<0.000000e+00> : vector<2x128xf32>
    %334 = tpu.matmul %295, %3, %cst_115 {dimension_numbers = #tpu.dot_dimension_numbers<[1], [0], [0], [1], [0, 0, 1, 1], [], []>} : vector<2x32xf32>, vector<32x128xf32>, vector<2x128xf32> -> vector<2x128xf32>
    %335 = arith.addf %33, %334 : vector<2x128xf32>
    %336 = math.tanh %335 : vector<2x128xf32>
    %337 = vector.extract_strided_slice %336 {offsets = [0, 0], sizes = [2, 32], strides = [1, 1]} : vector<2x128xf32> to vector<2x32xf32>
    %cst_116 = arith.constant 5.000000e-01 : f32
    %338 = vector.broadcast %cst_116 : f32 to vector<2x32xf32>
    %339 = arith.mulf %338, %337 : vector<2x32xf32>
    %cst_117 = arith.constant 5.000000e-01 : f32
    %340 = vector.broadcast %cst_117 : f32 to vector<2x32xf32>
    %341 = arith.addf %339, %340 : vector<2x32xf32>
    %342 = vector.extract_strided_slice %336 {offsets = [0, 32], sizes = [2, 32], strides = [1, 1]} : vector<2x128xf32> to vector<2x32xf32>
    %cst_118 = arith.constant 5.000000e-01 : f32
    %343 = vector.broadcast %cst_118 : f32 to vector<2x32xf32>
    %344 = arith.mulf %343, %342 : vector<2x32xf32>
    %cst_119 = arith.constant 5.000000e-01 : f32
    %345 = vector.broadcast %cst_119 : f32 to vector<2x32xf32>
    %346 = arith.addf %344, %345 : vector<2x32xf32>
    %347 = vector.extract_strided_slice %336 {offsets = [0, 64], sizes = [2, 32], strides = [1, 1]} : vector<2x128xf32> to vector<2x32xf32>
    %348 = vector.extract_strided_slice %336 {offsets = [0, 96], sizes = [2, 32], strides = [1, 1]} : vector<2x128xf32> to vector<2x32xf32>
    %cst_120 = arith.constant 5.000000e-01 : f32
    %349 = vector.broadcast %cst_120 : f32 to vector<2x32xf32>
    %350 = arith.mulf %349, %348 : vector<2x32xf32>
    %cst_121 = arith.constant 5.000000e-01 : f32
    %351 = vector.broadcast %cst_121 : f32 to vector<2x32xf32>
    %352 = arith.addf %350, %351 : vector<2x32xf32>
    %353 = arith.mulf %346, %293 : vector<2x32xf32>
    %354 = arith.mulf %341, %347 : vector<2x32xf32>
    %355 = arith.addf %353, %354 : vector<2x32xf32>
    %356 = math.tanh %355 : vector<2x32xf32>
    %357 = arith.mulf %352, %356 : vector<2x32xf32>
    %cst_122 = arith.constant dense<0.000000e+00> : vector<2x128xf32>
    %358 = tpu.matmul %357, %2, %cst_122 {dimension_numbers = #tpu.dot_dimension_numbers<[1], [0], [0], [1], [0, 0, 1, 1], [], []>} : vector<2x32xf32>, vector<32x128xf32>, vector<2x128xf32> -> vector<2x128xf32>
    %359 = vector.broadcast %6 : vector<1x128xf32> to vector<2x128xf32>
    %360 = arith.addf %358, %359 : vector<2x128xf32>
    %cst_123 = arith.constant dense<0.000000e+00> : vector<2x128xf32>
    %361 = tpu.matmul %322, %4, %cst_123 {dimension_numbers = #tpu.dot_dimension_numbers<[1], [0], [0], [1], [0, 0, 1, 1], [], []>} : vector<2x32xf32>, vector<32x128xf32>, vector<2x128xf32> -> vector<2x128xf32>
    %362 = arith.addf %360, %361 : vector<2x128xf32>
    %363 = math.tanh %362 : vector<2x128xf32>
    %364 = vector.extract_strided_slice %363 {offsets = [0, 0], sizes = [2, 32], strides = [1, 1]} : vector<2x128xf32> to vector<2x32xf32>
    %cst_124 = arith.constant 5.000000e-01 : f32
    %365 = vector.broadcast %cst_124 : f32 to vector<2x32xf32>
    %366 = arith.mulf %365, %364 : vector<2x32xf32>
    %cst_125 = arith.constant 5.000000e-01 : f32
    %367 = vector.broadcast %cst_125 : f32 to vector<2x32xf32>
    %368 = arith.addf %366, %367 : vector<2x32xf32>
    %369 = vector.extract_strided_slice %363 {offsets = [0, 32], sizes = [2, 32], strides = [1, 1]} : vector<2x128xf32> to vector<2x32xf32>
    %cst_126 = arith.constant 5.000000e-01 : f32
    %370 = vector.broadcast %cst_126 : f32 to vector<2x32xf32>
    %371 = arith.mulf %370, %369 : vector<2x32xf32>
    %cst_127 = arith.constant 5.000000e-01 : f32
    %372 = vector.broadcast %cst_127 : f32 to vector<2x32xf32>
    %373 = arith.addf %371, %372 : vector<2x32xf32>
    %374 = vector.extract_strided_slice %363 {offsets = [0, 64], sizes = [2, 32], strides = [1, 1]} : vector<2x128xf32> to vector<2x32xf32>
    %375 = vector.extract_strided_slice %363 {offsets = [0, 96], sizes = [2, 32], strides = [1, 1]} : vector<2x128xf32> to vector<2x32xf32>
    %cst_128 = arith.constant 5.000000e-01 : f32
    %376 = vector.broadcast %cst_128 : f32 to vector<2x32xf32>
    %377 = arith.mulf %376, %375 : vector<2x32xf32>
    %cst_129 = arith.constant 5.000000e-01 : f32
    %378 = vector.broadcast %cst_129 : f32 to vector<2x32xf32>
    %379 = arith.addf %377, %378 : vector<2x32xf32>
    %380 = arith.mulf %373, %320 : vector<2x32xf32>
    %381 = arith.mulf %368, %374 : vector<2x32xf32>
    %382 = arith.addf %380, %381 : vector<2x32xf32>
    %383 = math.tanh %382 : vector<2x32xf32>
    %384 = arith.mulf %379, %383 : vector<2x32xf32>
    %cst_130 = arith.constant dense<0.000000e+00> : vector<2x128xf32>
    %385 = tpu.matmul %384, %7, %cst_130 {dimension_numbers = #tpu.dot_dimension_numbers<[1], [0], [0], [1], [0, 0, 1, 1], [], []>} : vector<2x32xf32>, vector<32x128xf32>, vector<2x128xf32> -> vector<2x128xf32>
    %386 = vector.broadcast %8 : vector<1x128xf32> to vector<2x128xf32>
    %387 = arith.addf %385, %386 : vector<2x128xf32>
    %cst_131 = arith.constant 0.000000e+00 : f32
    %388 = vector.broadcast %cst_131 : f32 to vector<2x128xf32>
    %389 = arith.maximumf %387, %388 : vector<2x128xf32>
    %cst_132 = arith.constant 0.000000e+00 : f32
    %390 = vector.broadcast %cst_132 : f32 to vector<2x128xf32>
    %391 = arith.minimumf %387, %390 : vector<2x128xf32>
    %392 = vector.broadcast %9 : f32 to vector<2x128xf32>
    %393 = arith.mulf %392, %391 : vector<2x128xf32>
    %394 = arith.addf %389, %393 : vector<2x128xf32>
    %c0_133 = arith.constant 0 : index
    %c640 = arith.constant 640 : index
    %395 = vector.load %arg10[%c0_133, %c640] : memref<2x1024xf32, #tpu.memory_space<vmem>>, vector<2x128xf32>
    tpu.vector_store %arg10[%c0_133, %c640], %394 {strides = array<i32>} : memref<2x1024xf32, #tpu.memory_space<vmem>>, vector<2x128xf32>,
    %cst_134 = arith.constant dense<0.000000e+00> : vector<2x128xf32>
    %396 = tpu.matmul %357, %3, %cst_134 {dimension_numbers = #tpu.dot_dimension_numbers<[1], [0], [0], [1], [0, 0, 1, 1], [], []>} : vector<2x32xf32>, vector<32x128xf32>, vector<2x128xf32> -> vector<2x128xf32>
    %397 = arith.addf %37, %396 : vector<2x128xf32>
    %398 = math.tanh %397 : vector<2x128xf32>
    %399 = vector.extract_strided_slice %398 {offsets = [0, 0], sizes = [2, 32], strides = [1, 1]} : vector<2x128xf32> to vector<2x32xf32>
    %cst_135 = arith.constant 5.000000e-01 : f32
    %400 = vector.broadcast %cst_135 : f32 to vector<2x32xf32>
    %401 = arith.mulf %400, %399 : vector<2x32xf32>
    %cst_136 = arith.constant 5.000000e-01 : f32
    %402 = vector.broadcast %cst_136 : f32 to vector<2x32xf32>
    %403 = arith.addf %401, %402 : vector<2x32xf32>
    %404 = vector.extract_strided_slice %398 {offsets = [0, 32], sizes = [2, 32], strides = [1, 1]} : vector<2x128xf32> to vector<2x32xf32>
    %cst_137 = arith.constant 5.000000e-01 : f32
    %405 = vector.broadcast %cst_137 : f32 to vector<2x32xf32>
    %406 = arith.mulf %405, %404 : vector<2x32xf32>
    %cst_138 = arith.constant 5.000000e-01 : f32
    %407 = vector.broadcast %cst_138 : f32 to vector<2x32xf32>
    %408 = arith.addf %406, %407 : vector<2x32xf32>
    %409 = vector.extract_strided_slice %398 {offsets = [0, 64], sizes = [2, 32], strides = [1, 1]} : vector<2x128xf32> to vector<2x32xf32>
    %410 = vector.extract_strided_slice %398 {offsets = [0, 96], sizes = [2, 32], strides = [1, 1]} : vector<2x128xf32> to vector<2x32xf32>
    %cst_139 = arith.constant 5.000000e-01 : f32
    %411 = vector.broadcast %cst_139 : f32 to vector<2x32xf32>
    %412 = arith.mulf %411, %410 : vector<2x32xf32>
    %cst_140 = arith.constant 5.000000e-01 : f32
    %413 = vector.broadcast %cst_140 : f32 to vector<2x32xf32>
    %414 = arith.addf %412, %413 : vector<2x32xf32>
    %415 = arith.mulf %408, %355 : vector<2x32xf32>
    %416 = arith.mulf %403, %409 : vector<2x32xf32>
    %417 = arith.addf %415, %416 : vector<2x32xf32>
    %418 = math.tanh %417 : vector<2x32xf32>
    %419 = arith.mulf %414, %418 : vector<2x32xf32>
    %cst_141 = arith.constant dense<0.000000e+00> : vector<2x128xf32>
    %420 = tpu.matmul %419, %2, %cst_141 {dimension_numbers = #tpu.dot_dimension_numbers<[1], [0], [0], [1], [0, 0, 1, 1], [], []>} : vector<2x32xf32>, vector<32x128xf32>, vector<2x128xf32> -> vector<2x128xf32>
    %421 = vector.broadcast %6 : vector<1x128xf32> to vector<2x128xf32>
    %422 = arith.addf %420, %421 : vector<2x128xf32>
    %cst_142 = arith.constant dense<0.000000e+00> : vector<2x128xf32>
    %423 = tpu.matmul %384, %4, %cst_142 {dimension_numbers = #tpu.dot_dimension_numbers<[1], [0], [0], [1], [0, 0, 1, 1], [], []>} : vector<2x32xf32>, vector<32x128xf32>, vector<2x128xf32> -> vector<2x128xf32>
    %424 = arith.addf %422, %423 : vector<2x128xf32>
    %425 = math.tanh %424 : vector<2x128xf32>
    %426 = vector.extract_strided_slice %425 {offsets = [0, 0], sizes = [2, 32], strides = [1, 1]} : vector<2x128xf32> to vector<2x32xf32>
    %cst_143 = arith.constant 5.000000e-01 : f32
    %427 = vector.broadcast %cst_143 : f32 to vector<2x32xf32>
    %428 = arith.mulf %427, %426 : vector<2x32xf32>
    %cst_144 = arith.constant 5.000000e-01 : f32
    %429 = vector.broadcast %cst_144 : f32 to vector<2x32xf32>
    %430 = arith.addf %428, %429 : vector<2x32xf32>
    %431 = vector.extract_strided_slice %425 {offsets = [0, 32], sizes = [2, 32], strides = [1, 1]} : vector<2x128xf32> to vector<2x32xf32>
    %cst_145 = arith.constant 5.000000e-01 : f32
    %432 = vector.broadcast %cst_145 : f32 to vector<2x32xf32>
    %433 = arith.mulf %432, %431 : vector<2x32xf32>
    %cst_146 = arith.constant 5.000000e-01 : f32
    %434 = vector.broadcast %cst_146 : f32 to vector<2x32xf32>
    %435 = arith.addf %433, %434 : vector<2x32xf32>
    %436 = vector.extract_strided_slice %425 {offsets = [0, 64], sizes = [2, 32], strides = [1, 1]} : vector<2x128xf32> to vector<2x32xf32>
    %437 = vector.extract_strided_slice %425 {offsets = [0, 96], sizes = [2, 32], strides = [1, 1]} : vector<2x128xf32> to vector<2x32xf32>
    %cst_147 = arith.constant 5.000000e-01 : f32
    %438 = vector.broadcast %cst_147 : f32 to vector<2x32xf32>
    %439 = arith.mulf %438, %437 : vector<2x32xf32>
    %cst_148 = arith.constant 5.000000e-01 : f32
    %440 = vector.broadcast %cst_148 : f32 to vector<2x32xf32>
    %441 = arith.addf %439, %440 : vector<2x32xf32>
    %442 = arith.mulf %435, %382 : vector<2x32xf32>
    %443 = arith.mulf %430, %436 : vector<2x32xf32>
    %444 = arith.addf %442, %443 : vector<2x32xf32>
    %445 = math.tanh %444 : vector<2x32xf32>
    %446 = arith.mulf %441, %445 : vector<2x32xf32>
    %cst_149 = arith.constant dense<0.000000e+00> : vector<2x128xf32>
    %447 = tpu.matmul %446, %7, %cst_149 {dimension_numbers = #tpu.dot_dimension_numbers<[1], [0], [0], [1], [0, 0, 1, 1], [], []>} : vector<2x32xf32>, vector<32x128xf32>, vector<2x128xf32> -> vector<2x128xf32>
    %448 = vector.broadcast %8 : vector<1x128xf32> to vector<2x128xf32>
    %449 = arith.addf %447, %448 : vector<2x128xf32>
    %cst_150 = arith.constant 0.000000e+00 : f32
    %450 = vector.broadcast %cst_150 : f32 to vector<2x128xf32>
    %451 = arith.maximumf %449, %450 : vector<2x128xf32>
    %cst_151 = arith.constant 0.000000e+00 : f32
    %452 = vector.broadcast %cst_151 : f32 to vector<2x128xf32>
    %453 = arith.minimumf %449, %452 : vector<2x128xf32>
    %454 = vector.broadcast %9 : f32 to vector<2x128xf32>
    %455 = arith.mulf %454, %453 : vector<2x128xf32>
    %456 = arith.addf %451, %455 : vector<2x128xf32>
    %c0_152 = arith.constant 0 : index
    %c768 = arith.constant 768 : index
    %457 = vector.load %arg10[%c0_152, %c768] : memref<2x1024xf32, #tpu.memory_space<vmem>>, vector<2x128xf32>
    tpu.vector_store %arg10[%c0_152, %c768], %456 {strides = array<i32>} : memref<2x1024xf32, #tpu.memory_space<vmem>>, vector<2x128xf32>,
    %cst_153 = arith.constant dense<0.000000e+00> : vector<2x128xf32>
    %458 = tpu.matmul %419, %3, %cst_153 {dimension_numbers = #tpu.dot_dimension_numbers<[1], [0], [0], [1], [0, 0, 1, 1], [], []>} : vector<2x32xf32>, vector<32x128xf32>, vector<2x128xf32> -> vector<2x128xf32>
    %459 = arith.addf %41, %458 : vector<2x128xf32>
    %460 = math.tanh %459 : vector<2x128xf32>
    %461 = vector.extract_strided_slice %460 {offsets = [0, 0], sizes = [2, 32], strides = [1, 1]} : vector<2x128xf32> to vector<2x32xf32>
    %cst_154 = arith.constant 5.000000e-01 : f32
    %462 = vector.broadcast %cst_154 : f32 to vector<2x32xf32>
    %463 = arith.mulf %462, %461 : vector<2x32xf32>
    %cst_155 = arith.constant 5.000000e-01 : f32
    %464 = vector.broadcast %cst_155 : f32 to vector<2x32xf32>
    %465 = arith.addf %463, %464 : vector<2x32xf32>
    %466 = vector.extract_strided_slice %460 {offsets = [0, 32], sizes = [2, 32], strides = [1, 1]} : vector<2x128xf32> to vector<2x32xf32>
    %cst_156 = arith.constant 5.000000e-01 : f32
    %467 = vector.broadcast %cst_156 : f32 to vector<2x32xf32>
    %468 = arith.mulf %467, %466 : vector<2x32xf32>
    %cst_157 = arith.constant 5.000000e-01 : f32
    %469 = vector.broadcast %cst_157 : f32 to vector<2x32xf32>
    %470 = arith.addf %468, %469 : vector<2x32xf32>
    %471 = vector.extract_strided_slice %460 {offsets = [0, 64], sizes = [2, 32], strides = [1, 1]} : vector<2x128xf32> to vector<2x32xf32>
    %472 = vector.extract_strided_slice %460 {offsets = [0, 96], sizes = [2, 32], strides = [1, 1]} : vector<2x128xf32> to vector<2x32xf32>
    %cst_158 = arith.constant 5.000000e-01 : f32
    %473 = vector.broadcast %cst_158 : f32 to vector<2x32xf32>
    %474 = arith.mulf %473, %472 : vector<2x32xf32>
    %cst_159 = arith.constant 5.000000e-01 : f32
    %475 = vector.broadcast %cst_159 : f32 to vector<2x32xf32>
    %476 = arith.addf %474, %475 : vector<2x32xf32>
    %477 = arith.mulf %470, %417 : vector<2x32xf32>
    %478 = arith.mulf %465, %471 : vector<2x32xf32>
    %479 = arith.addf %477, %478 : vector<2x32xf32>
    %480 = math.tanh %479 : vector<2x32xf32>
    %481 = arith.mulf %476, %480 : vector<2x32xf32>
    %cst_160 = arith.constant dense<0.000000e+00> : vector<2x128xf32>
    %482 = tpu.matmul %481, %2, %cst_160 {dimension_numbers = #tpu.dot_dimension_numbers<[1], [0], [0], [1], [0, 0, 1, 1], [], []>} : vector<2x32xf32>, vector<32x128xf32>, vector<2x128xf32> -> vector<2x128xf32>
    %483 = vector.broadcast %6 : vector<1x128xf32> to vector<2x128xf32>
    %484 = arith.addf %482, %483 : vector<2x128xf32>
    %cst_161 = arith.constant dense<0.000000e+00> : vector<2x128xf32>
    %485 = tpu.matmul %446, %4, %cst_161 {dimension_numbers = #tpu.dot_dimension_numbers<[1], [0], [0], [1], [0, 0, 1, 1], [], []>} : vector<2x32xf32>, vector<32x128xf32>, vector<2x128xf32> -> vector<2x128xf32>
    %486 = arith.addf %484, %485 : vector<2x128xf32>
    %487 = math.tanh %486 : vector<2x128xf32>
    %488 = vector.extract_strided_slice %487 {offsets = [0, 0], sizes = [2, 32], strides = [1, 1]} : vector<2x128xf32> to vector<2x32xf32>
    %cst_162 = arith.constant 5.000000e-01 : f32
    %489 = vector.broadcast %cst_162 : f32 to vector<2x32xf32>
    %490 = arith.mulf %489, %488 : vector<2x32xf32>
    %cst_163 = arith.constant 5.000000e-01 : f32
    %491 = vector.broadcast %cst_163 : f32 to vector<2x32xf32>
    %492 = arith.addf %490, %491 : vector<2x32xf32>
    %493 = vector.extract_strided_slice %487 {offsets = [0, 32], sizes = [2, 32], strides = [1, 1]} : vector<2x128xf32> to vector<2x32xf32>
    %cst_164 = arith.constant 5.000000e-01 : f32
    %494 = vector.broadcast %cst_164 : f32 to vector<2x32xf32>
    %495 = arith.mulf %494, %493 : vector<2x32xf32>
    %cst_165 = arith.constant 5.000000e-01 : f32
    %496 = vector.broadcast %cst_165 : f32 to vector<2x32xf32>
    %497 = arith.addf %495, %496 : vector<2x32xf32>
    %498 = vector.extract_strided_slice %487 {offsets = [0, 64], sizes = [2, 32], strides = [1, 1]} : vector<2x128xf32> to vector<2x32xf32>
    %499 = vector.extract_strided_slice %487 {offsets = [0, 96], sizes = [2, 32], strides = [1, 1]} : vector<2x128xf32> to vector<2x32xf32>
    %cst_166 = arith.constant 5.000000e-01 : f32
    %500 = vector.broadcast %cst_166 : f32 to vector<2x32xf32>
    %501 = arith.mulf %500, %499 : vector<2x32xf32>
    %cst_167 = arith.constant 5.000000e-01 : f32
    %502 = vector.broadcast %cst_167 : f32 to vector<2x32xf32>
    %503 = arith.addf %501, %502 : vector<2x32xf32>
    %504 = arith.mulf %497, %444 : vector<2x32xf32>
    %505 = arith.mulf %492, %498 : vector<2x32xf32>
    %506 = arith.addf %504, %505 : vector<2x32xf32>
    %507 = math.tanh %506 : vector<2x32xf32>
    %508 = arith.mulf %503, %507 : vector<2x32xf32>
    %cst_168 = arith.constant dense<0.000000e+00> : vector<2x128xf32>
    %509 = tpu.matmul %508, %7, %cst_168 {dimension_numbers = #tpu.dot_dimension_numbers<[1], [0], [0], [1], [0, 0, 1, 1], [], []>} : vector<2x32xf32>, vector<32x128xf32>, vector<2x128xf32> -> vector<2x128xf32>
    %510 = vector.broadcast %8 : vector<1x128xf32> to vector<2x128xf32>
    %511 = arith.addf %509, %510 : vector<2x128xf32>
    %cst_169 = arith.constant 0.000000e+00 : f32
    %512 = vector.broadcast %cst_169 : f32 to vector<2x128xf32>
    %513 = arith.maximumf %511, %512 : vector<2x128xf32>
    %cst_170 = arith.constant 0.000000e+00 : f32
    %514 = vector.broadcast %cst_170 : f32 to vector<2x128xf32>
    %515 = arith.minimumf %511, %514 : vector<2x128xf32>
    %516 = vector.broadcast %9 : f32 to vector<2x128xf32>
    %517 = arith.mulf %516, %515 : vector<2x128xf32>
    %518 = arith.addf %513, %517 : vector<2x128xf32>
    %c0_171 = arith.constant 0 : index
    %c896 = arith.constant 896 : index
    %519 = vector.load %arg10[%c0_171, %c896] : memref<2x1024xf32, #tpu.memory_space<vmem>>, vector<2x128xf32>
    tpu.vector_store %arg10[%c0_171, %c896], %518 {strides = array<i32>} : memref<2x1024xf32, #tpu.memory_space<vmem>>, vector<2x128xf32>,
    %c0_172 = arith.constant 0 : index
    %c0_173 = arith.constant 0 : index
    %c0_174 = arith.constant 0 : index
    %520 = vector.load %arg11[%c0_172, %c0_173, %c0_174] : memref<2x2x32xf32, #tpu.memory_space<vmem>>, vector<1x2x32xf32>
    %521 = vector.shape_cast %520 : vector<1x2x32xf32> to vector<2x32xf32>
    %522 = vector.shape_cast %481 : vector<2x32xf32> to vector<1x2x32xf32>
    tpu.vector_store %arg11[%c0_172, %c0_173, %c0_174], %522 {strides = array<i32>} : memref<2x2x32xf32, #tpu.memory_space<vmem>>, vector<1x2x32xf32>,
    %c0_175 = arith.constant 0 : index
    %c0_176 = arith.constant 0 : index
    %c0_177 = arith.constant 0 : index
    %523 = vector.load %arg12[%c0_175, %c0_176, %c0_177] : memref<2x2x32xf32, #tpu.memory_space<vmem>>, vector<1x2x32xf32>
    %524 = vector.shape_cast %523 : vector<1x2x32xf32> to vector<2x32xf32>
    %525 = vector.shape_cast %479 : vector<2x32xf32> to vector<1x2x32xf32>
    tpu.vector_store %arg12[%c0_175, %c0_176, %c0_177], %525 {strides = array<i32>} : memref<2x2x32xf32, #tpu.memory_space<vmem>>, vector<1x2x32xf32>,
    %c1 = arith.constant 1 : index
    %c0_178 = arith.constant 0 : index
    %c0_179 = arith.constant 0 : index
    %526 = vector.load %arg11[%c1, %c0_178, %c0_179] : memref<2x2x32xf32, #tpu.memory_space<vmem>>, vector<1x2x32xf32>
    %527 = vector.shape_cast %526 : vector<1x2x32xf32> to vector<2x32xf32>
    %528 = vector.shape_cast %508 : vector<2x32xf32> to vector<1x2x32xf32>
    tpu.vector_store %arg11[%c1, %c0_178, %c0_179], %528 {strides = array<i32>} : memref<2x2x32xf32, #tpu.memory_space<vmem>>, vector<1x2x32xf32>,
    %c1_180 = arith.constant 1 : index
    %c0_181 = arith.constant 0 : index
    %c0_182 = arith.constant 0 : index
    %529 = vector.load %arg12[%c1_180, %c0_181, %c0_182] : memref<2x2x32xf32, #tpu.memory_space<vmem>>, vector<1x2x32xf32>
    %530 = vector.shape_cast %529 : vector<1x2x32xf32> to vector<2x32xf32>
    %531 = vector.shape_cast %506 : vector<2x32xf32> to vector<1x2x32xf32>
    tpu.vector_store %arg12[%c1_180, %c0_181, %c0_182], %531 {strides = array<i32>} : memref<2x2x32xf32, #tpu.memory_space<vmem>>, vector<1x2x32xf32>,
    return
  }
}

</mosaic_0001>

<bundles_post_ra>
// kernel: lstm_encoder_forward.1
= control target key start
LH: loop header
LB: loop body
LE: loop exit
PB: predicated region body
PF: predicated region fallthrough
CT: control target
= control target key end

     0   :  { %19 = vsyncpa [#allocation4], 0  ;;  %s5086_s0 = inlined_call_operand.vmem [shape: f32[2,32], index: 0, kind: input, shape index: {}]   ;;  %s5087_s1 = inlined_call_operand.vmem [shape: f32[4,128], index: 1, kind: input, shape index: {}]   ;;  %s5088_s2 = inlined_call_operand.vmem [shape: f32[32,128], index: 2, kind: input, shape index: {}]   ;;  %s5089_s3 = inlined_call_operand.vmem [shape: f32[32,128], index: 3, kind: input, shape index: {}]   ;;  %s5090_s4 = inlined_call_operand.hbm [shape: f32[32,128], index: 4, kind: input, shape index: {}]   ;;  %s5091_s5 = inlined_call_operand.hbm [shape: f32[1,128], index: 5, kind: input, shape index: {}]   ;;  %s5092_s6 = inlined_call_operand.hbm [shape: f32[1,128], index: 6, kind: input, shape index: {}]   ;;  %s5093_s7 = inlined_call_operand.hbm [shape: f32[32,128], index: 7, kind: input, shape index: {}]   ;;  %s5094_s8 = inlined_call_operand.hbm [shape: f32[1,128], index: 8, kind: input, shape index: {}]   ;;  %s5095_s9 = inlined_call_operand.<no memory space> [shape: f32[1], index: 9, kind: input, shape index: {}]   ;;  %s5096_s10 = inlined_call_operand.vmem [shape: f32[2,1024], index: 10, kind: output, shape index: {0}]   ;;  %s5097_s11 = inlined_call_operand.hbm [shape: f32[2,2,32], index: 11, kind: output, shape index: {1}]   ;;  %s5098_s12 = inlined_call_operand.hbm [shape: f32[2,2,32], index: 12, kind: output, shape index: {2}]  }
   0x1   :  { %20 = vsyncpa [#allocation7], 0 }
   0x2   :  { %21 = vsyncpa [#allocation10], 0 }
   0x3   :  { %22 = vsyncpa [#allocation5], 0 }
   0x4   :  { %23 = vsyncpa [#allocation14], 0  ;;  %s4408_s21 = smov [#allocation6]   ;;  %s4244_s25 = scalar_lea.hbm %s5091_s5, 16 }
   0x5   :  { %s50_s22 = sshll.u32 %s4408_s21, 4  ;;  %p4245_p0 = scmp.ne.s32.totalorder %s5091_s5, %s4244_s25  ;;  %s51_s22 = int_to_ptr.vmem [resolvable:$true] %s50_s22 }
   0x6   :  { %p4248_p1 = scmp.lt.u32.totalorder %s4244_s25, %s5091_s5 }
   0x8   :  { %p4250_p2 = pnand %p4248_p1, %p4245_p0 }
   0xa   :  { %4253 = shalt.err (!%p4250_p2)
}
   0xb   :  { %s4254_s30 = scalar_lea.vmem %s51_s22, 16  ;;  %s4258_s13 = scalar_lea.vmem %s51_s22, 32 }
   0xc   :  { %p4255_p3 = scmp.ne.s32.totalorder %s51_s22, %s4254_s30  ;;  %p4259_p4 = scmp.lt.s32.totalorder %s51_s22, %s51_s22 }
   0xd   :  { %p4260_p5 = scmp.lt.s32.totalorder %s4258_s13, %s4254_s30 }
   0xf   :  { %p4261_p6 = por %p4260_p5, %p4259_p4 }
  0x11   :  { %p4262_p7 = pnand %p4261_p6, %p4255_p3 }
  0x13   :  { %4265 = shalt.err (!%p4262_p7)
}
  0x14   :  { %53 = dma.hbm_to_vmem [thread:$0]  %s5091_s5, 16, %s51_s22, [#allocation7]  }
  0x15   :  { %s4409_s16 = smov [#allocation9]   ;;  %s4410_s18 = smov [#allocation3]  }
  0x16   :  { %s69_s17 = sshll.u32 %s4409_s16, 4  ;;  %s37_s19 = sshll.u32 %s4410_s18, 4  ;;  %s70_s17 = int_to_ptr.vmem [resolvable:$true] %s69_s17  ;;  %s38_s19 = int_to_ptr.vmem [resolvable:$true] %s37_s19 }
  0x17   :  { %s4266_s23 = scalar_lea.hbm %s5093_s7, 512 }
  0x18   :  { %p4267_p8 = scmp.ne.s32.totalorder %s5093_s7, %s4266_s23  ;;  %p4270_p9 = scmp.lt.u32.totalorder %s4266_s23, %s5093_s7 }
  0x1a   :  { %p4272_p10 = pnand %p4270_p9, %p4267_p8 }
  0x1c   :  { %4275 = shalt.err (!%p4272_p10)
}
  0x1d   :  { %s4276_s5 = scalar_lea.vmem %s70_s17, 512  ;;  %p4281_p12 = scmp.lt.s32.totalorder %s70_s17, %s70_s17 }
  0x1e   :  { %p4277_p11 = scmp.ne.s32.totalorder %s70_s17, %s4276_s5  ;;  %p4282_p13 = scmp.lt.s32.totalorder %s4276_s5, %s4276_s5 }
  0x20   :  { %p4283_p0 = por %p4282_p13, %p4281_p12 }
  0x22   :  { %p4284_p1 = pnand %p4283_p0, %p4277_p11 }
  0x24   :  { %4287 = shalt.err (!%p4284_p1)
}
  0x25   :  { %s4411_s22 = smov 128   ;;  %s4412_s28 = smov 8  }
  0x26   :  { %75 = dma.hbm_to_vmem [thread:$0]  %s5093_s7, 512, %s70_s17, [#allocation10], %s4411_s22, %s4411_s22, %s4412_s28  }
  0x27   :  { %s4288_s15 = scalar_lea.hbm %s5090_s4, 512 }
  0x28   :  { %p4289_p2 = scmp.ne.s32.totalorder %s5090_s4, %s4288_s15  ;;  %p4292_p3 = scmp.lt.u32.totalorder %s4288_s15, %s5090_s4 }
  0x2a   :  { %p4294_p4 = pnand %p4292_p3, %p4289_p2 }
  0x2c   :  { %4297 = shalt.err (!%p4294_p4)
}
  0x2d   :  { %s4298_s23 = scalar_lea.vmem %s38_s19, 512  ;;  %p4303_p6 = scmp.lt.s32.totalorder %s38_s19, %s38_s19 }
  0x2e   :  { %p4299_p5 = scmp.ne.s32.totalorder %s38_s19, %s4298_s23  ;;  %p4304_p7 = scmp.lt.s32.totalorder %s4298_s23, %s4298_s23 }
  0x30   :  { %p4305_p8 = por %p4304_p7, %p4303_p6 }
  0x32   :  { %p4306_p9 = pnand %p4305_p8, %p4299_p5 }
  0x34   :  { %4309 = shalt.err (!%p4306_p9)
}
  0x35   :  { %43 = dma.hbm_to_vmem [thread:$0]  %s5090_s4, 512, %s38_s19, [#allocation4], %s4411_s22, %s4411_s22, %s4412_s28  }
  0x36   :  { %s4413_s24 = smov [#allocation8]   ;;  %s4414_s26 = smov [#allocation11]  }
  0x37   :  { %s60_s25 = sshll.u32 %s4413_s24, 4  ;;  %s82_s27 = sshll.u32 %s4414_s26, 4  ;;  %s61_s25 = int_to_ptr.vmem [resolvable:$true] %s60_s25  ;;  %s83_s27 = int_to_ptr.vmem [resolvable:$true] %s82_s27 }
  0x38   :  { %s4310_s30 = scalar_lea.hbm %s5092_s6, 16 }
  0x39   :  { %p4311_p10 = scmp.ne.s32.totalorder %s5092_s6, %s4310_s30  ;;  %p4314_p11 = scmp.lt.u32.totalorder %s4310_s30, %s5092_s6 }
  0x3b   :  { %p4316_p12 = pnand %p4314_p11, %p4311_p10 }
  0x3d   :  { %4319 = shalt.err (!%p4316_p12)
}
  0x3e   :  { %s4320_s4 = scalar_lea.vmem %s61_s25, 16  ;;  %s4324_s19 = scalar_lea.vmem %s61_s25, 32 }
  0x3f   :  { %p4321_p13 = scmp.ne.s32.totalorder %s61_s25, %s4320_s4  ;;  %p4325_p0 = scmp.lt.s32.totalorder %s61_s25, %s61_s25 }
  0x40   :  { %p4326_p1 = scmp.lt.s32.totalorder %s4324_s19, %s4320_s4 }
  0x42   :  { %p4327_p2 = por %p4326_p1, %p4325_p0 }
  0x44   :  { %p4328_p3 = pnand %p4327_p2, %p4321_p13 }
  0x46   :  { %4331 = shalt.err (!%p4328_p3)
}
  0x47   :  { %63 = dma.hbm_to_vmem [thread:$0]  %s5092_s6, 16, %s61_s25, [#allocation7]  }
  0x48   :  { %s4332_s21 = scalar_lea.hbm %s5094_s8, 16 }
  0x49   :  { %p4333_p4 = scmp.ne.s32.totalorder %s5094_s8, %s4332_s21  ;;  %p4336_p5 = scmp.lt.u32.totalorder %s4332_s21, %s5094_s8 }
  0x4b   :  { %p4338_p6 = pnand %p4336_p5, %p4333_p4 }
  0x4d   :  { %4341 = shalt.err (!%p4338_p6)
}
  0x4e   :  { %s4342_s26 = scalar_lea.vmem %s83_s27, 16  ;;  %s4346_s5 = scalar_lea.vmem %s83_s27, 32 }
  0x4f   :  { %p4343_p7 = scmp.ne.s32.totalorder %s83_s27, %s4342_s26  ;;  %p4347_p8 = scmp.lt.s32.totalorder %s83_s27, %s83_s27 }
  0x50   :  { %p4348_p9 = scmp.lt.s32.totalorder %s4346_s5, %s4342_s26 }
  0x52   :  { %p4349_p10 = por %p4348_p9, %p4347_p8 }
  0x54   :  { %p4350_p11 = pnand %p4349_p10, %p4343_p7 }
  0x56   :  { %4353 = shalt.err (!%p4350_p11)
}
  0x57   :  { %85 = dma.hbm_to_vmem [thread:$0]  %s5094_s8, 16, %s83_s27, [#allocation10]  }
  0x58   :  { %4398 = dma.done.wait [#allocation4], 512  }
  0x59   :  { %4399 = vsyncadd [#allocation4], 4294966784 }
  0x5a   :  { %4400 = dma.done.wait [#allocation7], 32  }
  0x5b   :  { %4401 = vsyncadd [#allocation7], 4294967264 }
  0x5c   :  { %4402 = dma.done.wait [#allocation10], 528  }
  0x5d   :  { %4403 = vsyncadd [#allocation10], 4294966768  ;;  %v4415_v0 = vmov 0.0   ;;  %vm4416_vm0 = vmmov 0   ;;  %vm135_vm1 = vcmask 1043456   ;;  %vm131_vm2 = vcmask 31744  }
  0x5e   :  { %3562 = vmatprep.subr.mxu0 %v4415_v0  ;;  %3564 = vmatprep.mubr.msk.f32.mxu0 %vm4416_vm0, %v4415_v0  ;;  %v4565_v1 = vld [vmem:[%s5087_s1] sm:$0xf]  ;;  %s4418_s1 = smov 120   ;;  %s4419_s13 = smov 112   ;;  %v4420_v14 = vmov 0.0|0.0   ;;  %v106_v17 = vld [vmem:[%s5088_s2 + $0x8] sm:$0xff]  ;;  %v4723_v59 = vstv %s5095_s9 }
  0x5f   :  { %3567 = vmatprep.subr.mxu1 %v4415_v0  ;;  %3569 = vmatprep.mubr.msk.f32.mxu1 %vm4416_vm0, %v4415_v0  ;;  %v4570_v2 = vld [vmem:[%s5086_s0] sm:$0x3]  ;;  %s4417_s0 = smov 64   ;;  %s4421_s14 = smov 96   ;;  %v107_v21 = vld [vmem:[%s5088_s2 + $0x10] sm:$0xff]  ;;  %v108_v22 = vld [vmem:[%s5088_s2 + $0x18] sm:$0xff] }
  0x60   :  { %3563 = vmatpush3.msk.msra.mxu0 %vm135_vm1, %v4565_v1  ;;  %3568 = vmatpush3.msk.msra.mxu1 %vm135_vm1, %v4565_v1  ;;  %v4585_v3 = vld [vmem:[#allocation6] ss:$0 sm:$0xff]  ;;  %s4422_s15 = smov 104   ;;  %s4423_s28 = smov 32   ;;  %v4625_v24 = vpack.c.bf16 %v108_v22, %v107_v21  ;;  %vm750_vm3 = vcmask 261120   ;;  %v119_v41 = vld [vmem:[#allocation9] sm:$0xff] }
  0x61   :  { %3565 = vmatmul.mubr.msk.f32.vlgmr.msra.gmra.mrb[0].mxu0 %vm131_vm2, %v4570_v2  ;;  %3572 = vmatprep.subr.mxu0 %v4415_v0  ;;  %v105_v16 = vld [vmem:[%s5088_s2] sm:$0xff]  ;;  %s4424_s2 = smov 124   ;;  %s4425_s7 = smov 108   ;;  %v120_v42 = vld [vmem:[#allocation9 + $0x8] sm:$0xff]  ;;  %v121_v45 = vld [vmem:[#allocation9 + $0x10] sm:$0xff]  ;;  %vm3292_vm4 = vcmask 254976  }
  0x62   :  { %3573 = vmatpush3.msk.msra.mxu0 %vm135_vm1, %v4565_v1  ;;  %3574 = vmatprep.mubr.msk.f32.mxu0 %vm4416_vm0, %v4415_v0  ;;  %v4614_v20 = vpack.c.bf16 %v106_v17, %v105_v16  ;;  %v4642_v26 = vld [vmem:[#allocation8] ss:$0 sm:$0xff]  ;;  %s4426_s17 = smov 116   ;;  %s4427_s24 = smov 100   ;;  %v4674_v44 = vpack.c.bf16 %v120_v42, %v119_v41  ;;  %v110_v49 = vld [vmem:[%s5089_s3 + $0x8] sm:$0xff]  ;;  %v111_v51 = vld [vmem:[%s5089_s3 + $0x10] sm:$0xff] }
  0x63   :  { %3582 = vmatprep.subr.mxu0 %v4415_v0  ;;  %3577 = vmatprep.subr.mxu1 %v4415_v0  ;;  %v122_v46 = vld [vmem:[#allocation9 + $0x18] sm:$0xff]  ;;  %v4717_v55 = vld [vmem:[#allocation11] ss:$0 sm:$0xff]  ;;  %v115_v22 = vld [vmem:[#allocation3 + $0x10] sm:$0xff]  ;;  %s4429_s26 = smov [#allocation13]  }
  0x64   :  { %283 = vrot.lane.b32.xlu1 %v4570_v2, %s4418_s1  ;;  %v4679_v47 = vpack.c.bf16 %v122_v46, %v121_v45  ;;  %v109_v48 = vld [vmem:[%s5089_s3] sm:$0xff]  ;;  %v112_v52 = vld [vmem:[%s5089_s3 + $0x18] sm:$0xff]  ;;  %s3327_s5 = sshll.u32 %s4429_s26, 4  ;;  %s3328_s5 = int_to_ptr.vmem [resolvable:$true] %s3327_s5 }
  0x65   :  { %v4692_v50 = vpack.c.bf16 %v110_v49, %v109_v48  ;;  %v4702_v54 = vpack.c.bf16 %v112_v52, %v111_v51 }
  0x68   :  { %431 = vrot.lane.b32.xlu1 %v4570_v2, %s4419_s13 }
  0xd6   :  { %v284_v12 = vpop.permute.xlu1 %283 }
  0xd7   :  { %3575 = vmatmul.mubr.msk.f32.vlgmr.msra.gmra.mrb[2].mxu0 %vm131_vm2, %v284_v12 }
  0xd8   :  { %3583 = vmatpush3.msk.msra.mxu0 %vm135_vm1, %v4565_v1  ;;  %3584 = vmatprep.mubr.msk.f32.mxu0 %vm4416_vm0, %v4415_v0 }
  0xd9   :  { %3592 = vmatprep.subr.mxu0 %v4415_v0 }
  0xda   :  { %v432_v13 = vpop.permute.xlu1 %431 }
  0xdb   :  { %3585 = vmatmul.mubr.msk.f32.vlgmr.msra.gmra.mrb[4].mxu0 %vm131_vm2, %v432_v13 }
  0xdc   :  { %3593 = vmatpush3.msk.msra.mxu0 %vm135_vm1, %v4565_v1  ;;  %3594 = vmatprep.mubr.msk.f32.mxu0 %vm4416_vm0, %v4415_v0 }
  0xdd   :  { %3932 = vmatprep.subr.bf16.mxu0 %v4420_v14 }
 0x134   :  { %v205_v4 = vpop.f32.mrb[0].mxu0 }
 0x135   :  { %v206_v5 = vadd.f32 %v4585_v3, %v205_v4  ;;  %v3566_v6 = vpop.f32.mrb[1].mxu0 }
 0x137   :  { %4177 = vtanh.f32 %v206_v5 }
 0x141   :  { %v4178_v7 = vpop.eup %4177 }
 0x142   :  { %731 = vrot.lane.b32.xlu0 %v4178_v7, %s4417_s0  ;;  %v728_v8 = vmul.f32 0.5, %v4178_v7 }
 0x144   :  { %v729_v9 = vadd.f32 0.5, %v728_v8 }
 0x1b4   :  { %v732_v10 = vpop.permute.xlu0 %731 }
 0x1b5   :  { %v4591_v11 = vmul.f32 %v732_v10, %v729_v9 }
 0x1b7   :  { %4179 = vtanh.f32 %v4591_v11 }
 0x1c1   :  { %v4180_v15 = vpop.eup %4179 }
 0x1c2   :  { %737 = vrot.lane.b32.xlu0 %v4180_v15, %s4421_s14 }
 0x1c6   :  { %579 = vrot.lane.b32.xlu0 %v4570_v2, %s4422_s15 }
 0x234   :  { %v738_v18 = vpop.permute.xlu0 %737 }
 0x235   :  { %v740_v19 = vmul.f32 %v738_v18, %v729_v9  ;;  %v113_v18 = vld [vmem:[#allocation3] sm:$0xff] }
 0x237   :  { %748 = vrot.lane.b32.xlu1 %v740_v19, %s4423_s28  ;;  %v114_v19 = vld [vmem:[#allocation3 + $0x8] sm:$0xff] }
 0x238   :  { %v580_v23 = vpop.permute.xlu0 %579  ;;  %v4734_v21 = vpack.c.bf16 %v114_v19, %v113_v18 }
 0x239   :  { %3595 = vmatmul.mubr.msk.f32.vlgmr.msra.gmra.mrb[6].mxu0 %vm131_vm2, %v580_v23  ;;  %v116_v23 = vld [vmem:[#allocation3 + $0x18] sm:$0xff] }
 0x23a   :  { %3934 = vmatpush3.bf16.msra.mxu0 %v4614_v20  ;;  %3610 = vmatprep.mubr.msk.f32.mxu0 %vm4416_vm0, %v4415_v0 }
 0x23b   :  { %3935 = vmatprep.subr.bf16.mxu0 %v4420_v14 }
 0x23e   :  { %3937 = vmatpush3.bf16.msra.mxu0 %v4625_v24 }
 0x23f   :  { %3950 = vmatprep.subr.bf16.mxu0 %v4420_v14 }
 0x2a9   :  { %v4632_v25 = vpop.permute.xlu1 %748 }
 0x2aa   :  { %3611 = vmatmul.mubr.msk.f32.vlgmr.msra.gmra.mrb[8].mxu0 %vm750_vm3, %v4632_v25 }
 0x2ab   :  { %3952 = vmatpush3.bf16.msra.mxu0 %v4614_v20  ;;  %3643 = vmatprep.mubr.msk.f32.mxu0 %vm4416_vm0, %v4415_v0 }
 0x2ac   :  { %3953 = vmatprep.subr.bf16.mxu0 %v4420_v14 }
 0x2af   :  { %3955 = vmatpush3.bf16.msra.mxu0 %v4625_v24 }
 0x2b0   :  { %3956 = vmatprep.subr.bf16.mxu0 %v4420_v14 }
 0x37d   :  { %v819_v27 = vpop.f32.mrb[8].mxu0 }
 0x37e   :  { %v820_v28 = vadd.f32 %v4642_v26, %v819_v27  ;;  %v3612_v29 = vpop.f32.mrb[9].mxu0  ;;  %v4738_v27 = vpack.c.bf16 %v116_v23, %v115_v22 }
 0x380   :  { %4181 = vtanh.f32 %v820_v28 }
 0x38a   :  { %v4182_v30 = vpop.eup %4181 }
 0x38b   :  { %827 = vrot.lane.b32.xlu0 %v4182_v30, %s4417_s0  ;;  %v824_v31 = vmul.f32 0.5, %v4182_v30 }
 0x38d   :  { %v825_v32 = vadd.f32 0.5, %v824_v31 }
 0x38f   :  { %209 = vrot.lane.b32.xlu0 %v4570_v2, %s4424_s2 }
 0x393   :  { %505 = vrot.lane.b32.xlu0 %v4570_v2, %s4425_s7 }
 0x3fd   :  { %v828_v33 = vpop.permute.xlu0 %827 }
 0x3fe   :  { %v4648_v34 = vmul.f32 %v828_v33, %v825_v32 }
 0x400   :  { %4183 = vtanh.f32 %v4648_v34 }
 0x401   :  { %v210_v35 = vpop.permute.xlu0 %209 }
 0x402   :  { %3570 = vmatmul.mubr.msk.f32.vlgmr.msra.gmra.mrb[0].mxu1 %vm131_vm2, %v210_v35 }
 0x403   :  { %3578 = vmatpush3.msk.msra.mxu1 %vm135_vm1, %v4565_v1  ;;  %3579 = vmatprep.mubr.msk.f32.mxu1 %vm4416_vm0, %v4415_v0 }
 0x404   :  { %3587 = vmatprep.subr.mxu1 %v4415_v0 }
 0x405   :  { %v506_v40 = vpop.permute.xlu0 %505 }
 0x40a   :  { %v4184_v36 = vpop.eup %4183 }
 0x40b   :  { %833 = vrot.lane.b32.xlu1 %v4184_v36, %s4421_s14 }
 0x40f   :  { %357 = vrot.lane.b32.xlu1 %v4570_v2, %s4426_s17 }
 0x413   :  { %653 = vrot.lane.b32.xlu1 %v4570_v2, %s4427_s24 }
 0x47d   :  { %v834_v37 = vpop.permute.xlu1 %833 }
 0x47e   :  { %v836_v38 = vmul.f32 %v834_v37, %v825_v32 }
 0x480   :  { %844 = vrot.lane.b32.xlu0 %v836_v38, %s4423_s28 }
 0x481   :  { %v358_v39 = vpop.permute.xlu1 %357 }
 0x482   :  { %3580 = vmatmul.mubr.msk.f32.vlgmr.msra.gmra.mrb[2].mxu1 %vm131_vm2, %v358_v39 }
 0x483   :  { %3588 = vmatpush3.msk.msra.mxu1 %vm135_vm1, %v4565_v1  ;;  %3589 = vmatprep.mubr.msk.f32.mxu1 %vm4416_vm0, %v4415_v0 }
 0x484   :  { %999 = vrot.lane.b32.xlu0 %v4591_v11, %s4423_s28  ;;  %3597 = vmatprep.subr.mxu1 %v4415_v0 }
 0x485   :  { %v654_v43 = vpop.permute.xlu1 %653 }
 0x486   :  { %3590 = vmatmul.mubr.msk.f32.vlgmr.msra.gmra.mrb[4].mxu1 %vm131_vm2, %v506_v40 }
 0x487   :  { %3598 = vmatpush3.msk.msra.mxu1 %vm135_vm1, %v4565_v1  ;;  %3599 = vmatprep.mubr.msk.f32.mxu1 %vm4416_vm0, %v4415_v0 }
 0x488   :  { %3938 = vmatprep.subr.bf16.mxu1 %v4420_v14 }
 0x48a   :  { %3600 = vmatmul.mubr.msk.f32.vlgmr.msra.gmra.mrb[6].mxu1 %vm131_vm2, %v654_v43 }
 0x48b   :  { %3940 = vmatpush3.bf16.msra.mxu1 %v4674_v44  ;;  %3621 = vmatprep.mubr.msk.f32.mxu1 %vm4416_vm0, %v4415_v0 }
 0x48c   :  { %3941 = vmatprep.subr.bf16.mxu1 %v4420_v14 }
 0x48f   :  { %3943 = vmatpush3.bf16.msra.mxu1 %v4679_v47 }
 0x490   :  { %3944 = vmatprep.subr.bf16.mxu1 %v4420_v14 }
 0x4f2   :  { %v845_v53 = vpop.permute.xlu0 %844 }
 0x4f3   :  { %3622 = vmatmul.mubr.msk.f32.vlgmr.msra.gmra.mrb[8].mxu1 %vm750_vm3, %v845_v53 }
 0x4f4   :  { %3946 = vmatpush3.bf16.msra.mxu1 %v4692_v50  ;;  %3632 = vmatprep.mubr.msk.f32.mxu1 %vm4416_vm0, %v4415_v0 }
 0x4f5   :  { %3947 = vmatprep.subr.bf16.mxu1 %v4420_v14 }
 0x4f6   :  { %v1000_v10 = vpop.permute.xlu0 %999 }
 0x4f8   :  { %3949 = vmatpush3.bf16.msra.mxu1 %v4702_v54 }
 0x4f9   :  { %3962 = vmatprep.subr.bf16.mxu1 %v4420_v14 }
 0x4fb   :  { %3633 = vmatmul.mubr.msk.f32.vlgmr.msra.gmra.mrb[0].mxu1 %vm750_vm3, %v4632_v25 }
 0x4fc   :  { %3964 = vmatpush3.bf16.msra.mxu1 %v4674_v44  ;;  %3665 = vmatprep.mubr.msk.f32.mxu1 %vm4416_vm0, %v4415_v0 }
 0x4fd   :  { %3965 = vmatprep.subr.bf16.mxu1 %v4420_v14 }
 0x500   :  { %3967 = vmatpush3.bf16.msra.mxu1 %v4679_v47 }
 0x501   :  { %3974 = vmatprep.subr.bf16.mxu1 %v4420_v14 }
 0x5c6   :  { %v914_v56 = vpop.f32.mrb[8].mxu1 }
 0x5c7   :  { %v915_v57 = vadd.f32 %v4717_v55, %v914_v56  ;;  %v3623_v58 = vpop.f32.mrb[9].mxu1 }
 0x5c9   :  { %v919_v60 = vmin.f32 %v915_v57, 0.0  ;;  %v918_v61 = vmax.f32 %v915_v57, 0.0 }
 0x5cb   :  { %v921_v62 = vmul.f32 %v4723_v59, %v919_v60 }
 0x5cd   :  { %v922_v63 = vadd.f32 %v921_v62, %v918_v61 }
 0x5ce   :  { %v990_v1 = vpop.f32.mrb[0].mxu1 }
 0x5cf   :  { %923 = vst [vmem:[%s5096_s10] sm:$0x3] %v922_v63  ;;  %v4112_v2 = vadd.f32 %v4585_v3, %v990_v1  ;;  %v3634_v4 = vpop.f32.mrb[1].mxu1 }
 0x5d1   :  { %4185 = vtanh.f32 %v4112_v2 }
 0x5db   :  { %v4186_v5 = vpop.eup %4185 }
 0x5dc   :  { %1004 = vrot.lane.b32.xlu1 %v4186_v5, %s4417_s0  ;;  %v996_v6 = vmul.f32 0.5, %v4186_v5 }
 0x5de   :  { %v997_v7 = vadd.f32 0.5, %v996_v6 }
 0x5e0   :  { %v1002_v11 = vmul.f32 %v1000_v10, %v997_v7 }
 0x64e   :  { %v1005_v8 = vpop.permute.xlu1 %1004 }
 0x64f   :  { %v1007_v9 = vmul.f32 %v1005_v8, %v997_v7 }
 0x651   :  { %1009 = vrot.lane.b32.xlu1 %v1007_v9, %s4423_s28 }
 0x6c3   :  { %v1010_v12 = vpop.permute.xlu1 %1009 }
 0x6c4   :  { %v1012_v13 = vadd.f32 %v1010_v12, %v1002_v11 }
 0x6c6   :  { %4187 = vtanh.f32 %v1012_v13 }
 0x6d0   :  { %v4188_v15 = vpop.eup %4187 }
 0x6d1   :  { %1015 = vrot.lane.b32.xlu0 %v4188_v15, %s4417_s0 }
 0x743   :  { %v1016_v16 = vpop.permute.xlu0 %1015 }
 0x744   :  { %v1018_v17 = vmul.f32 %v1016_v16, %v997_v7 }
 0x746   :  { %1020 = vrot.lane.b32.xlu1 %v1018_v17, %s4423_s28 }
 0x7b8   :  { %v1021_v25 = vpop.permute.xlu1 %1020 }
 0x7b9   :  { %3644 = vmatmul.mubr.msk.f32.vlgmr.msra.gmra.mrb[10].mxu0 %vm750_vm3, %v1021_v25 }
 0x7ba   :  { %3958 = vmatpush3.bf16.msra.mxu0 %v4734_v21  ;;  %3654 = vmatprep.mubr.msk.f32.mxu0 %vm4416_vm0, %v4415_v0 }
 0x7bb   :  { %3959 = vmatprep.subr.bf16.mxu0 %v4420_v14 }
 0x7be   :  { %3961 = vmatpush3.bf16.msra.mxu0 %v4738_v27 }
 0x7bf   :  { %3968 = vmatprep.subr.bf16.mxu0 %v4420_v14 }
 0x7c1   :  { %3655 = vmatmul.mubr.msk.f32.vlgmr.msra.gmra.mrb[10].mxu0 %vm750_vm3, %v845_v53 }
 0x7c2   :  { %3970 = vmatpush3.bf16.msra.mxu0 %v4692_v50  ;;  %3676 = vmatprep.mubr.msk.f32.mxu0 %vm4416_vm0, %v4415_v0 }
 0x7c3   :  { %3971 = vmatprep.subr.bf16.mxu0 %v4420_v14 }
 0x7c6   :  { %3973 = vmatpush3.bf16.msra.mxu0 %v4702_v54 }
 0x7c7   :  { %3986 = vmatprep.subr.bf16.mxu0 %v4420_v14 }
 0x7c9   :  { %3677 = vmatmul.mubr.msk.f32.vlgmr.msra.gmra.mrb[2].mxu0 %vm750_vm3, %v1021_v25 }
 0x7ca   :  { %3988 = vmatpush3.bf16.msra.mxu0 %v4674_v44  ;;  %3709 = vmatprep.mubr.msk.f32.mxu0 %vm4416_vm0, %v4415_v0 }
 0x7cb   :  { %3989 = vmatprep.subr.bf16.mxu0 %v4420_v14 }
 0x7ce   :  { %3991 = vmatpush3.bf16.msra.mxu0 %v4679_v47 }
 0x7cf   :  { %3998 = vmatprep.subr.bf16.mxu0 %v4420_v14 }
 0x894   :  { %v1160_v28 = vpop.f32.mrb[10].mxu0 }
 0x895   :  { %v4119_v29 = vadd.f32 %v4642_v26, %v1160_v28  ;;  %v3656_v30 = vpop.f32.mrb[11].mxu0 }
 0x897   :  { %4189 = vtanh.f32 %v4119_v29 }
 0x89c   :  { %v1335_v31 = vpop.f32.mrb[2].mxu0 }
 0x89d   :  { %v4113_v32 = vadd.f32 %v4585_v3, %v1335_v31  ;;  %v3678_v33 = vpop.f32.mrb[3].mxu0 }
 0x89f   :  { %4191 = vtanh.f32 %v4113_v32 }
 0x8a1   :  { %v4190_v35 = vpop.eup %4189 }
 0x8a2   :  { %1174 = vrot.lane.b32.xlu0 %v4190_v35, %s4417_s0  ;;  %v1166_v37 = vmul.f32 0.5, %v4190_v35 }
 0x8a4   :  { %v1167_v38 = vadd.f32 0.5, %v1166_v37 }
 0x8a6   :  { %1169 = vrot.lane.b32.xlu0 %v4648_v34, %s4423_s28 }
 0x8a9   :  { %v4192_v36 = vpop.eup %4191 }
 0x8aa   :  { %1345 = vrot.lane.b32.xlu1 %v4192_v36, %s4417_s0  ;;  %v1341_v41 = vmul.f32 0.5, %v4192_v36 }
 0x8ac   :  { %v1342_v42 = vadd.f32 0.5, %v1341_v41 }
 0x8ae   :  { %v1343_v34 = vmul.f32 %v1342_v42, %v1012_v13 }
 0x914   :  { %v1175_v39 = vpop.permute.xlu0 %1174 }
 0x915   :  { %v1177_v40 = vmul.f32 %v1175_v39, %v1167_v38 }
 0x917   :  { %1179 = vrot.lane.b32.xlu1 %v1177_v40, %s4423_s28 }
 0x918   :  { %v1170_v46 = vpop.permute.xlu0 %1169 }
 0x919   :  { %v1172_v48 = vmul.f32 %v1170_v46, %v1167_v38 }
 0x91c   :  { %v1346_v43 = vpop.permute.xlu1 %1345 }
 0x91d   :  { %v1348_v45 = vmul.f32 %v1346_v43, %v1342_v42 }
 0x91f   :  { %1350 = vrot.lane.b32.xlu0 %v1348_v45, %s4423_s28 }
 0x989   :  { %v1180_v49 = vpop.permute.xlu1 %1179 }
 0x98a   :  { %v4767_v51 = vadd.f32 %v1180_v49, %v1172_v48 }
 0x98c   :  { %4193 = vtanh.f32 %v4767_v51 }
 0x991   :  { %v1351_v52 = vpop.permute.xlu0 %1350 }
 0x992   :  { %v4770_v53 = vadd.f32 %v1351_v52, %v1343_v34 }
 0x994   :  { %4195 = vtanh.f32 %v4770_v53 }
 0x996   :  { %v4194_v56 = vpop.eup %4193 }
 0x997   :  { %1185 = vrot.lane.b32.xlu1 %v4194_v56, %s4417_s0 }
 0x99e   :  { %v4196_v57 = vpop.eup %4195 }
 0x99f   :  { %1356 = vrot.lane.b32.xlu0 %v4196_v57, %s4417_s0 }
 0xa09   :  { %v1186_v58 = vpop.permute.xlu1 %1185 }
 0xa0a   :  { %v1188_v60 = vmul.f32 %v1186_v58, %v1167_v38 }
 0xa0c   :  { %1190 = vrot.lane.b32.xlu1 %v1188_v60, %s4423_s28 }
 0xa11   :  { %v1357_v61 = vpop.permute.xlu0 %1356 }
 0xa12   :  { %v1359_v62 = vmul.f32 %v1357_v61, %v1342_v42 }
 0xa14   :  { %1361 = vrot.lane.b32.xlu0 %v1359_v62, %s4423_s28 }
 0xa7e   :  { %v1191_v63 = vpop.permute.xlu1 %1190 }
 0xa7f   :  { %3666 = vmatmul.mubr.msk.f32.vlgmr.msra.gmra.mrb[10].mxu1 %vm750_vm3, %v1191_v63 }
 0xa80   :  { %3976 = vmatpush3.bf16.msra.mxu1 %v4614_v20  ;;  %3687 = vmatprep.mubr.msk.f32.mxu1 %vm4416_vm0, %v4415_v0 }
 0xa81   :  { %3977 = vmatprep.subr.bf16.mxu1 %v4420_v14 }
 0xa84   :  { %3979 = vmatpush3.bf16.msra.mxu1 %v4625_v24 }
 0xa85   :  { %3980 = vmatprep.subr.bf16.mxu1 %v4420_v14 }
 0xa86   :  { %v1362_v1 = vpop.permute.xlu0 %1361 }
 0xa87   :  { %3688 = vmatmul.mubr.msk.f32.vlgmr.msra.gmra.mrb[12].mxu1 %vm750_vm3, %v1362_v1 }
 0xa88   :  { %3982 = vmatpush3.bf16.msra.mxu1 %v4734_v21  ;;  %3698 = vmatprep.mubr.msk.f32.mxu1 %vm4416_vm0, %v4415_v0 }
 0xa89   :  { %3983 = vmatprep.subr.bf16.mxu1 %v4420_v14 }
 0xa8c   :  { %3985 = vmatpush3.bf16.msra.mxu1 %v4738_v27 }
 0xa8d   :  { %3992 = vmatprep.subr.bf16.mxu1 %v4420_v14 }
 0xa8f   :  { %3699 = vmatmul.mubr.msk.f32.vlgmr.msra.gmra.mrb[12].mxu1 %vm750_vm3, %v1191_v63 }
 0xa90   :  { %3994 = vmatpush3.bf16.msra.mxu1 %v4692_v50  ;;  %3720 = vmatprep.mubr.msk.f32.mxu1 %vm4416_vm0, %v4415_v0 }
 0xa91   :  { %3995 = vmatprep.subr.bf16.mxu1 %v4420_v14 }
 0xa94   :  { %3997 = vmatpush3.bf16.msra.mxu1 %v4702_v54 }
 0xa95   :  { %4010 = vmatprep.subr.bf16.mxu1 %v4420_v14 }
 0xa97   :  { %3721 = vmatmul.mubr.msk.f32.vlgmr.msra.gmra.mrb[2].mxu1 %vm750_vm3, %v1362_v1 }
 0xa98   :  { %4012 = vmatpush3.bf16.msra.mxu1 %v4674_v44  ;;  %3753 = vmatprep.mubr.msk.f32.mxu1 %vm4416_vm0, %v4415_v0 }
 0xa99   :  { %4013 = vmatprep.subr.bf16.mxu1 %v4420_v14 }
 0xa9c   :  { %4015 = vmatpush3.bf16.msra.mxu1 %v4679_v47 }
 0xa9d   :  { %4022 = vmatprep.subr.bf16.mxu1 %v4420_v14 }
 0xb52   :  { %v1260_v2 = vpop.f32.mrb[10].mxu1 }
 0xb53   :  { %v1261_v4 = vadd.f32 %v4717_v55, %v1260_v2  ;;  %v3667_v5 = vpop.f32.mrb[11].mxu1 }
 0xb55   :  { %v1265_v6 = vmin.f32 %v1261_v4, 0.0  ;;  %v1264_v7 = vmax.f32 %v1261_v4, 0.0 }
 0xb57   :  { %v1266_v8 = vmul.f32 %v1265_v6, %v4723_v59 }
 0xb59   :  { %v1267_v9 = vadd.f32 %v1266_v8, %v1264_v7 }
 0xb5b   :  { %1268 = vst [vmem:[%s5096_s10 + $0x2] sm:$0x3] %v1267_v9 }
 0xb62   :  { %v1501_v10 = vpop.f32.mrb[12].mxu1 }
 0xb63   :  { %v4120_v11 = vadd.f32 %v4642_v26, %v1501_v10  ;;  %v3700_v12 = vpop.f32.mrb[13].mxu1 }
 0xb65   :  { %4197 = vtanh.f32 %v4120_v11 }
 0xb6a   :  { %v1672_v13 = vpop.f32.mrb[2].mxu1 }
 0xb6b   :  { %v4114_v15 = vadd.f32 %v4585_v3, %v1672_v13  ;;  %v3722_v16 = vpop.f32.mrb[3].mxu1 }
 0xb6d   :  { %4199 = vtanh.f32 %v4114_v15 }
 0xb6f   :  { %v4198_v17 = vpop.eup %4197 }
 0xb70   :  { %1511 = vrot.lane.b32.xlu1 %v4198_v17, %s4417_s0  ;;  %v1507_v19 = vmul.f32 0.5, %v4198_v17 }
 0xb72   :  { %v1508_v22 = vadd.f32 0.5, %v1507_v19 }
 0xb74   :  { %v1509_v32 = vmul.f32 %v1508_v22, %v4767_v51 }
 0xb77   :  { %v4200_v18 = vpop.eup %4199 }
 0xb78   :  { %1682 = vrot.lane.b32.xlu0 %v4200_v18, %s4417_s0  ;;  %v1678_v28 = vmul.f32 0.5, %v4200_v18 }
 0xb7a   :  { %v1679_v29 = vadd.f32 0.5, %v1678_v28 }
 0xb7c   :  { %v1680_v36 = vmul.f32 %v1679_v29, %v4770_v53 }
 0xbe2   :  { %v1512_v23 = vpop.permute.xlu1 %1511 }
 0xbe3   :  { %v1514_v25 = vmul.f32 %v1512_v23, %v1508_v22 }
 0xbe5   :  { %1516 = vrot.lane.b32.xlu1 %v1514_v25, %s4423_s28 }
 0xbea   :  { %v1683_v30 = vpop.permute.xlu0 %1682 }
 0xbeb   :  { %v1685_v31 = vmul.f32 %v1683_v30, %v1679_v29 }
 0xbed   :  { %1687 = vrot.lane.b32.xlu0 %v1685_v31, %s4423_s28 }
 0xc57   :  { %v1517_v33 = vpop.permute.xlu1 %1516 }
 0xc58   :  { %v4817_v35 = vadd.f32 %v1517_v33, %v1509_v32 }
 0xc5a   :  { %4201 = vtanh.f32 %v4817_v35 }
 0xc5f   :  { %v1688_v37 = vpop.permute.xlu0 %1687 }
 0xc60   :  { %v4821_v38 = vadd.f32 %v1688_v37, %v1680_v36 }
 0xc62   :  { %4203 = vtanh.f32 %v4821_v38 }
 0xc64   :  { %v4202_v39 = vpop.eup %4201 }
 0xc65   :  { %1522 = vrot.lane.b32.xlu1 %v4202_v39, %s4417_s0 }
 0xc6c   :  { %v4204_v40 = vpop.eup %4203 }
 0xc6d   :  { %1693 = vrot.lane.b32.xlu0 %v4204_v40, %s4417_s0 }
 0xcd7   :  { %v1523_v41 = vpop.permute.xlu1 %1522 }
 0xcd8   :  { %v1525_v42 = vmul.f32 %v1523_v41, %v1508_v22 }
 0xcda   :  { %1527 = vrot.lane.b32.xlu1 %v1525_v42, %s4423_s28 }
 0xcdf   :  { %v1694_v43 = vpop.permute.xlu0 %1693 }
 0xce0   :  { %v1696_v45 = vmul.f32 %v1694_v43, %v1679_v29 }
 0xce2   :  { %1698 = vrot.lane.b32.xlu0 %v1696_v45, %s4423_s28 }
 0xd4c   :  { %v1528_v46 = vpop.permute.xlu1 %1527 }
 0xd4d   :  { %3710 = vmatmul.mubr.msk.f32.vlgmr.msra.gmra.mrb[12].mxu0 %vm750_vm3, %v1528_v46 }
 0xd4e   :  { %4000 = vmatpush3.bf16.msra.mxu0 %v4614_v20  ;;  %3731 = vmatprep.mubr.msk.f32.mxu0 %vm4416_vm0, %v4415_v0 }
 0xd4f   :  { %4001 = vmatprep.subr.bf16.mxu0 %v4420_v14 }
 0xd52   :  { %4003 = vmatpush3.bf16.msra.mxu0 %v4625_v24 }
 0xd53   :  { %4004 = vmatprep.subr.bf16.mxu0 %v4420_v14 }
 0xd54   :  { %v1699_v48 = vpop.permute.xlu0 %1698 }
 0xd55   :  { %3732 = vmatmul.mubr.msk.f32.vlgmr.msra.gmra.mrb[14].mxu0 %vm750_vm3, %v1699_v48 }
 0xd56   :  { %4006 = vmatpush3.bf16.msra.mxu0 %v4734_v21  ;;  %3742 = vmatprep.mubr.msk.f32.mxu0 %vm4416_vm0, %v4415_v0 }
 0xd57   :  { %4007 = vmatprep.subr.bf16.mxu0 %v4420_v14 }
 0xd5a   :  { %4009 = vmatpush3.bf16.msra.mxu0 %v4738_v27 }
 0xd5b   :  { %4016 = vmatprep.subr.bf16.mxu0 %v4420_v14 }
 0xd5d   :  { %3743 = vmatmul.mubr.msk.f32.vlgmr.msra.gmra.mrb[14].mxu0 %vm750_vm3, %v1528_v46 }
 0xd5e   :  { %4018 = vmatpush3.bf16.msra.mxu0 %v4692_v50  ;;  %3764 = vmatprep.mubr.msk.f32.mxu0 %vm4416_vm0, %v4415_v0 }
 0xd5f   :  { %4019 = vmatprep.subr.bf16.mxu0 %v4420_v14 }
 0xd62   :  { %4021 = vmatpush3.bf16.msra.mxu0 %v4702_v54 }
 0xd63   :  { %4034 = vmatprep.subr.bf16.mxu0 %v4420_v14 }
 0xd65   :  { %3765 = vmatmul.mubr.msk.f32.vlgmr.msra.gmra.mrb[4].mxu0 %vm750_vm3, %v1699_v48 }
 0xd66   :  { %4036 = vmatpush3.bf16.msra.mxu0 %v4674_v44  ;;  %3797 = vmatprep.mubr.msk.f32.mxu0 %vm4416_vm0, %v4415_v0 }
 0xd67   :  { %4037 = vmatprep.subr.bf16.mxu0 %v4420_v14 }
 0xd6a   :  { %4039 = vmatpush3.bf16.msra.mxu0 %v4679_v47 }
 0xd6b   :  { %4046 = vmatprep.subr.bf16.mxu0 %v4420_v14 }
 0xe20   :  { %v1597_v49 = vpop.f32.mrb[12].mxu0 }
 0xe21   :  { %v1598_v51 = vadd.f32 %v4717_v55, %v1597_v49  ;;  %v3711_v34 = vpop.f32.mrb[13].mxu0 }
 0xe23   :  { %v1602_v52 = vmin.f32 %v1598_v51, 0.0  ;;  %v1601_v53 = vmax.f32 %v1598_v51, 0.0 }
 0xe25   :  { %v1603_v56 = vmul.f32 %v1602_v52, %v4723_v59 }
 0xe27   :  { %v1604_v57 = vadd.f32 %v1603_v56, %v1601_v53 }
 0xe29   :  { %1605 = vst [vmem:[%s5096_s10 + $0x4] sm:$0x3] %v1604_v57 }
 0xe30   :  { %v1838_v58 = vpop.f32.mrb[14].mxu0 }
 0xe31   :  { %v4121_v60 = vadd.f32 %v4642_v26, %v1838_v58  ;;  %v3744_v61 = vpop.f32.mrb[15].mxu0 }
 0xe33   :  { %4205 = vtanh.f32 %v4121_v60 }
 0xe38   :  { %v2009_v62 = vpop.f32.mrb[4].mxu0 }
 0xe39   :  { %v4115_v63 = vadd.f32 %v4585_v3, %v2009_v62  ;;  %v3766_v1 = vpop.f32.mrb[5].mxu0 }
 0xe3b   :  { %4207 = vtanh.f32 %v4115_v63 }
 0xe3d   :  { %v4206_v2 = vpop.eup %4205 }
 0xe3e   :  { %1848 = vrot.lane.b32.xlu1 %v4206_v2, %s4417_s0  ;;  %v1844_v5 = vmul.f32 0.5, %v4206_v2 }
 0xe40   :  { %v1845_v6 = vadd.f32 0.5, %v1844_v5 }
 0xe42   :  { %v1846_v13 = vmul.f32 %v1845_v6, %v4817_v35 }
 0xe45   :  { %v4208_v4 = vpop.eup %4207 }
 0xe46   :  { %2019 = vrot.lane.b32.xlu0 %v4208_v4, %s4417_s0  ;;  %v2015_v9 = vmul.f32 0.5, %v4208_v4 }
 0xe48   :  { %v2016_v10 = vadd.f32 0.5, %v2015_v9 }
 0xe4a   :  { %v2017_v17 = vmul.f32 %v2016_v10, %v4821_v38 }
 0xeb0   :  { %v1849_v7 = vpop.permute.xlu1 %1848 }
 0xeb1   :  { %v1851_v8 = vmul.f32 %v1849_v7, %v1845_v6 }
 0xeb3   :  { %1853 = vrot.lane.b32.xlu1 %v1851_v8, %s4423_s28 }
 0xeb8   :  { %v2020_v11 = vpop.permute.xlu0 %2019 }
 0xeb9   :  { %v2022_v12 = vmul.f32 %v2020_v11, %v2016_v10 }
 0xebb   :  { %2024 = vrot.lane.b32.xlu0 %v2022_v12, %s4423_s28 }
 0xf25   :  { %v1854_v15 = vpop.permute.xlu1 %1853 }
 0xf26   :  { %v4868_v16 = vadd.f32 %v1854_v15, %v1846_v13 }
 0xf28   :  { %4209 = vtanh.f32 %v4868_v16 }
 0xf2d   :  { %v2025_v18 = vpop.permute.xlu0 %2024 }
 0xf2e   :  { %v4872_v19 = vadd.f32 %v2025_v18, %v2017_v17 }
 0xf30   :  { %4211 = vtanh.f32 %v4872_v19 }
 0xf32   :  { %v4210_v22 = vpop.eup %4209 }
 0xf33   :  { %1859 = vrot.lane.b32.xlu1 %v4210_v22, %s4417_s0 }
 0xf3a   :  { %v4212_v23 = vpop.eup %4211 }
 0xf3b   :  { %2030 = vrot.lane.b32.xlu0 %v4212_v23, %s4417_s0 }
 0xfa5   :  { %v1860_v25 = vpop.permute.xlu1 %1859 }
 0xfa6   :  { %v1862_v28 = vmul.f32 %v1860_v25, %v1845_v6 }
 0xfa8   :  { %1864 = vrot.lane.b32.xlu1 %v1862_v28, %s4423_s28 }
 0xfad   :  { %v2031_v29 = vpop.permute.xlu0 %2030 }
 0xfae   :  { %v2033_v30 = vmul.f32 %v2031_v29, %v2016_v10 }
 0xfb0   :  { %2035 = vrot.lane.b32.xlu0 %v2033_v30, %s4423_s28 }
0x101a   :  { %v1865_v31 = vpop.permute.xlu1 %1864 }
0x101b   :  { %3754 = vmatmul.mubr.msk.f32.vlgmr.msra.gmra.mrb[14].mxu1 %vm750_vm3, %v1865_v31 }
0x101c   :  { %4024 = vmatpush3.bf16.msra.mxu1 %v4614_v20  ;;  %3775 = vmatprep.mubr.msk.f32.mxu1 %vm4416_vm0, %v4415_v0 }
0x101d   :  { %4025 = vmatprep.subr.bf16.mxu1 %v4420_v14 }
0x1020   :  { %4027 = vmatpush3.bf16.msra.mxu1 %v4625_v24 }
0x1021   :  { %4028 = vmatprep.subr.bf16.mxu1 %v4420_v14 }
0x1022   :  { %v2036_v32 = vpop.permute.xlu0 %2035 }
0x1023   :  { %3776 = vmatmul.mubr.msk.f32.vlgmr.msra.gmra.mrb[16].mxu1 %vm750_vm3, %v2036_v32 }
0x1024   :  { %4030 = vmatpush3.bf16.msra.mxu1 %v4734_v21  ;;  %3786 = vmatprep.mubr.msk.f32.mxu1 %vm4416_vm0, %v4415_v0 }
0x1025   :  { %4031 = vmatprep.subr.bf16.mxu1 %v4420_v14 }
0x1028   :  { %4033 = vmatpush3.bf16.msra.mxu1 %v4738_v27 }
0x1029   :  { %4040 = vmatprep.subr.bf16.mxu1 %v4420_v14 }
0x102b   :  { %3787 = vmatmul.mubr.msk.f32.vlgmr.msra.gmra.mrb[16].mxu1 %vm750_vm3, %v1865_v31 }
0x102c   :  { %4042 = vmatpush3.bf16.msra.mxu1 %v4692_v50  ;;  %3808 = vmatprep.mubr.msk.f32.mxu1 %vm4416_vm0, %v4415_v0 }
0x102d   :  { %4043 = vmatprep.subr.bf16.mxu1 %v4420_v14 }
0x1030   :  { %4045 = vmatpush3.bf16.msra.mxu1 %v4702_v54 }
0x1031   :  { %4058 = vmatprep.subr.bf16.mxu1 %v4420_v14 }
0x1033   :  { %3809 = vmatmul.mubr.msk.f32.vlgmr.msra.gmra.mrb[4].mxu1 %vm750_vm3, %v2036_v32 }
0x1034   :  { %4060 = vmatpush3.bf16.msra.mxu1 %v4674_v44  ;;  %3841 = vmatprep.mubr.msk.f32.mxu1 %vm4416_vm0, %v4415_v0 }
0x1035   :  { %4061 = vmatprep.subr.bf16.mxu1 %v4420_v14 }
0x1038   :  { %4063 = vmatpush3.bf16.msra.mxu1 %v4679_v47 }
0x1039   :  { %4070 = vmatprep.subr.bf16.mxu1 %v4420_v14 }
0x10ee   :  { %v1934_v33 = vpop.f32.mrb[14].mxu1 }
0x10ef   :  { %v1935_v35 = vadd.f32 %v4717_v55, %v1934_v33  ;;  %v3755_v36 = vpop.f32.mrb[15].mxu1 }
0x10f1   :  { %v1939_v37 = vmin.f32 %v1935_v35, 0.0  ;;  %v1938_v38 = vmax.f32 %v1935_v35, 0.0 }
0x10f3   :  { %v1940_v39 = vmul.f32 %v1939_v37, %v4723_v59 }
0x10f5   :  { %v1941_v40 = vadd.f32 %v1940_v39, %v1938_v38 }
0x10f7   :  { %1942 = vst [vmem:[%s5096_s10 + $0x6] sm:$0x3] %v1941_v40 }
0x10fe   :  { %v2175_v41 = vpop.f32.mrb[16].mxu1 }
0x10ff   :  { %v4122_v42 = vadd.f32 %v4642_v26, %v2175_v41  ;;  %v3788_v43 = vpop.f32.mrb[17].mxu1 }
0x1101   :  { %4213 = vtanh.f32 %v4122_v42 }
0x1106   :  { %v2346_v45 = vpop.f32.mrb[4].mxu1 }
0x1107   :  { %v4116_v46 = vadd.f32 %v4585_v3, %v2346_v45  ;;  %v3810_v48 = vpop.f32.mrb[5].mxu1 }
0x1109   :  { %4215 = vtanh.f32 %v4116_v46 }
0x110b   :  { %v4214_v49 = vpop.eup %4213 }
0x110c   :  { %2185 = vrot.lane.b32.xlu1 %v4214_v49, %s4417_s0  ;;  %v2181_v34 = vmul.f32 0.5, %v4214_v49 }
0x110e   :  { %v2182_v52 = vadd.f32 0.5, %v2181_v34 }
0x1110   :  { %v2183_v62 = vmul.f32 %v2182_v52, %v4868_v16 }
0x1113   :  { %v4216_v51 = vpop.eup %4215 }
0x1114   :  { %2356 = vrot.lane.b32.xlu0 %v4216_v51, %s4417_s0  ;;  %v2352_v57 = vmul.f32 0.5, %v4216_v51 }
0x1116   :  { %v2353_v58 = vadd.f32 0.5, %v2352_v57 }
0x1118   :  { %v2354_v2 = vmul.f32 %v2353_v58, %v4872_v19 }
0x117e   :  { %v2186_v53 = vpop.permute.xlu1 %2185 }
0x117f   :  { %v2188_v56 = vmul.f32 %v2186_v53, %v2182_v52 }
0x1181   :  { %2190 = vrot.lane.b32.xlu1 %v2188_v56, %s4423_s28 }
0x1186   :  { %v2357_v60 = vpop.permute.xlu0 %2356 }
0x1187   :  { %v2359_v61 = vmul.f32 %v2357_v60, %v2353_v58 }
0x1189   :  { %2361 = vrot.lane.b32.xlu0 %v2359_v61, %s4423_s28 }
0x11f3   :  { %v2191_v63 = vpop.permute.xlu1 %2190 }
0x11f4   :  { %v4919_v1 = vadd.f32 %v2191_v63, %v2183_v62 }
0x11f6   :  { %4217 = vtanh.f32 %v4919_v1 }
0x11fb   :  { %v2362_v4 = vpop.permute.xlu0 %2361 }
0x11fc   :  { %v4923_v5 = vadd.f32 %v2362_v4, %v2354_v2 }
0x11fe   :  { %4219 = vtanh.f32 %v4923_v5 }
0x1200   :  { %v4218_v6 = vpop.eup %4217 }
0x1201   :  { %2196 = vrot.lane.b32.xlu1 %v4218_v6, %s4417_s0 }
0x1208   :  { %v4220_v7 = vpop.eup %4219 }
0x1209   :  { %2367 = vrot.lane.b32.xlu0 %v4220_v7, %s4417_s0 }
0x1273   :  { %v2197_v8 = vpop.permute.xlu1 %2196 }
0x1274   :  { %v2199_v9 = vmul.f32 %v2197_v8, %v2182_v52 }
0x1276   :  { %2201 = vrot.lane.b32.xlu1 %v2199_v9, %s4423_s28 }
0x127b   :  { %v2368_v10 = vpop.permute.xlu0 %2367 }
0x127c   :  { %v2370_v11 = vmul.f32 %v2368_v10, %v2353_v58 }
0x127e   :  { %2372 = vrot.lane.b32.xlu0 %v2370_v11, %s4423_s28 }
0x12e8   :  { %v2202_v12 = vpop.permute.xlu1 %2201 }
0x12e9   :  { %3798 = vmatmul.mubr.msk.f32.vlgmr.msra.gmra.mrb[16].mxu0 %vm750_vm3, %v2202_v12 }
0x12ea   :  { %4048 = vmatpush3.bf16.msra.mxu0 %v4614_v20  ;;  %3819 = vmatprep.mubr.msk.f32.mxu0 %vm4416_vm0, %v4415_v0 }
0x12eb   :  { %4049 = vmatprep.subr.bf16.mxu0 %v4420_v14 }
0x12ee   :  { %4051 = vmatpush3.bf16.msra.mxu0 %v4625_v24 }
0x12ef   :  { %4052 = vmatprep.subr.bf16.mxu0 %v4420_v14 }
0x12f0   :  { %v2373_v13 = vpop.permute.xlu0 %2372 }
0x12f1   :  { %3820 = vmatmul.mubr.msk.f32.vlgmr.msra.gmra.mrb[18].mxu0 %vm750_vm3, %v2373_v13 }
0x12f2   :  { %4054 = vmatpush3.bf16.msra.mxu0 %v4734_v21  ;;  %3830 = vmatprep.mubr.msk.f32.mxu0 %vm4416_vm0, %v4415_v0 }
0x12f3   :  { %4055 = vmatprep.subr.bf16.mxu0 %v4420_v14 }
0x12f6   :  { %4057 = vmatpush3.bf16.msra.mxu0 %v4738_v27 }
0x12f7   :  { %4064 = vmatprep.subr.bf16.mxu0 %v4420_v14 }
0x12f9   :  { %3831 = vmatmul.mubr.msk.f32.vlgmr.msra.gmra.mrb[18].mxu0 %vm750_vm3, %v2202_v12 }
0x12fa   :  { %4066 = vmatpush3.bf16.msra.mxu0 %v4692_v50  ;;  %3852 = vmatprep.mubr.msk.f32.mxu0 %vm4416_vm0, %v4415_v0 }
0x12fb   :  { %4067 = vmatprep.subr.bf16.mxu0 %v4420_v14 }
0x12fe   :  { %4069 = vmatpush3.bf16.msra.mxu0 %v4702_v54 }
0x12ff   :  { %4082 = vmatprep.subr.bf16.mxu0 %v4420_v14 }
0x1301   :  { %3853 = vmatmul.mubr.msk.f32.vlgmr.msra.gmra.mrb[6].mxu0 %vm750_vm3, %v2373_v13 }
0x1302   :  { %4084 = vmatpush3.bf16.msra.mxu0 %v4674_v44  ;;  %3885 = vmatprep.mubr.msk.f32.mxu0 %vm4416_vm0, %v4415_v0 }
0x1303   :  { %4085 = vmatprep.subr.bf16.mxu0 %v4420_v14 }
0x1306   :  { %4087 = vmatpush3.bf16.msra.mxu0 %v4679_v47 }
0x1307   :  { %4094 = vmatprep.subr.bf16.mxu0 %v4420_v14 }
0x13bc   :  { %v2271_v15 = vpop.f32.mrb[16].mxu0 }
0x13bd   :  { %v2272_v16 = vadd.f32 %v4717_v55, %v2271_v15  ;;  %v3799_v17 = vpop.f32.mrb[17].mxu0 }
0x13bf   :  { %v2276_v18 = vmin.f32 %v2272_v16, 0.0  ;;  %v2275_v19 = vmax.f32 %v2272_v16, 0.0 }
0x13c1   :  { %v2277_v22 = vmul.f32 %v2276_v18, %v4723_v59 }
0x13c3   :  { %v2278_v23 = vadd.f32 %v2277_v22, %v2275_v19 }
0x13c5   :  { %2279 = vst [vmem:[%s5096_s10 + $0x8] sm:$0x3] %v2278_v23 }
0x13cc   :  { %v2512_v25 = vpop.f32.mrb[18].mxu0 }
0x13cd   :  { %v4123_v28 = vadd.f32 %v4642_v26, %v2512_v25  ;;  %v3832_v29 = vpop.f32.mrb[19].mxu0 }
0x13cf   :  { %4221 = vtanh.f32 %v4123_v28 }
0x13d4   :  { %v2683_v30 = vpop.f32.mrb[6].mxu0 }
0x13d5   :  { %v4117_v31 = vadd.f32 %v4585_v3, %v2683_v30  ;;  %v3854_v32 = vpop.f32.mrb[7].mxu0 }
0x13d7   :  { %4223 = vtanh.f32 %v4117_v31 }
0x13d9   :  { %v4222_v33 = vpop.eup %4221 }
0x13da   :  { %2522 = vrot.lane.b32.xlu1 %v4222_v33, %s4417_s0  ;;  %v2518_v36 = vmul.f32 0.5, %v4222_v33 }
0x13dc   :  { %v2519_v37 = vadd.f32 0.5, %v2518_v36 }
0x13de   :  { %v2520_v3 = vmul.f32 %v2519_v37, %v4919_v1 }
0x13e1   :  { %v4224_v35 = vpop.eup %4223 }
0x13e2   :  { %2693 = vrot.lane.b32.xlu0 %v4224_v35, %s4417_s0  ;;  %v2689_v40 = vmul.f32 0.5, %v4224_v35 }
0x13e4   :  { %v2690_v41 = vadd.f32 0.5, %v2689_v40 }
0x13e6   :  { %v2691_v48 = vmul.f32 %v2690_v41, %v4923_v5 }
0x144c   :  { %v2523_v38 = vpop.permute.xlu1 %2522 }
0x144d   :  { %v2525_v39 = vmul.f32 %v2523_v38, %v2519_v37 }
0x144f   :  { %2527 = vrot.lane.b32.xlu1 %v2525_v39, %s4423_s28 }
0x1454   :  { %v2694_v42 = vpop.permute.xlu0 %2693 }
0x1455   :  { %v2696_v43 = vmul.f32 %v2694_v42, %v2690_v41 }
0x1457   :  { %2698 = vrot.lane.b32.xlu0 %v2696_v43, %s4423_s28 }
0x14c1   :  { %v2528_v45 = vpop.permute.xlu1 %2527 }
0x14c2   :  { %v4970_v46 = vadd.f32 %v2528_v45, %v2520_v3 }
0x14c4   :  { %4225 = vtanh.f32 %v4970_v46 }
0x14c9   :  { %v2699_v49 = vpop.permute.xlu0 %2698 }
0x14ca   :  { %v4974_v51 = vadd.f32 %v2699_v49, %v2691_v48 }
0x14cc   :  { %4227 = vtanh.f32 %v4974_v51 }
0x14ce   :  { %v4226_v34 = vpop.eup %4225 }
0x14cf   :  { %2533 = vrot.lane.b32.xlu1 %v4226_v34, %s4417_s0 }
0x14d6   :  { %v4228_v52 = vpop.eup %4227 }
0x14d7   :  { %2704 = vrot.lane.b32.xlu0 %v4228_v52, %s4417_s0 }
0x1541   :  { %v2534_v53 = vpop.permute.xlu1 %2533 }
0x1542   :  { %v2536_v56 = vmul.f32 %v2534_v53, %v2519_v37 }
0x1544   :  { %2538 = vrot.lane.b32.xlu1 %v2536_v56, %s4423_s28 }
0x1549   :  { %v2705_v57 = vpop.permute.xlu0 %2704 }
0x154a   :  { %v2707_v58 = vmul.f32 %v2705_v57, %v2690_v41 }
0x154c   :  { %2709 = vrot.lane.b32.xlu0 %v2707_v58, %s4423_s28 }
0x15b6   :  { %v2539_v60 = vpop.permute.xlu1 %2538 }
0x15b7   :  { %3842 = vmatmul.mubr.msk.f32.vlgmr.msra.gmra.mrb[18].mxu1 %vm750_vm3, %v2539_v60 }
0x15b8   :  { %4072 = vmatpush3.bf16.msra.mxu1 %v4614_v20  ;;  %3863 = vmatprep.mubr.msk.f32.mxu1 %vm4416_vm0, %v4415_v0 }
0x15b9   :  { %4073 = vmatprep.subr.bf16.mxu1 %v4420_v14 }
0x15bc   :  { %4075 = vmatpush3.bf16.msra.mxu1 %v4625_v24 }
0x15bd   :  { %4076 = vmatprep.subr.bf16.mxu1 %v4420_v14 }
0x15be   :  { %v2710_v61 = vpop.permute.xlu0 %2709 }
0x15bf   :  { %3864 = vmatmul.mubr.msk.f32.vlgmr.msra.gmra.mrb[20].mxu1 %vm750_vm3, %v2710_v61 }
0x15c0   :  { %4078 = vmatpush3.bf16.msra.mxu1 %v4734_v21  ;;  %3874 = vmatprep.mubr.msk.f32.mxu1 %vm4416_vm0, %v4415_v0 }
0x15c1   :  { %4079 = vmatprep.subr.bf16.mxu1 %v4420_v14 }
0x15c4   :  { %4081 = vmatpush3.bf16.msra.mxu1 %v4738_v27 }
0x15c5   :  { %4088 = vmatprep.subr.bf16.mxu1 %v4420_v14 }
0x15c7   :  { %3875 = vmatmul.mubr.msk.f32.vlgmr.msra.gmra.mrb[20].mxu1 %vm750_vm3, %v2539_v60 }
0x15c8   :  { %4090 = vmatpush3.bf16.msra.mxu1 %v4692_v50  ;;  %3896 = vmatprep.mubr.msk.f32.mxu1 %vm4416_vm0, %v4415_v0 }
0x15c9   :  { %4091 = vmatprep.subr.bf16.mxu1 %v4420_v14 }
0x15cc   :  { %4093 = vmatpush3.bf16.msra.mxu1 %v4702_v54 }
0x15cd   :  { %4106 = vmatprep.subr.bf16.mxu1 %v4420_v14 }
0x15cf   :  { %3897 = vmatmul.mubr.msk.f32.vlgmr.msra.gmra.mrb[6].mxu1 %vm750_vm3, %v2710_v61 }
0x15d0   :  { %4108 = vmatpush3.bf16.msra.mxu1 %v4674_v44  ;;  %3929 = vmatprep.mubr.msk.f32.mxu1 %vm4416_vm0, %v4415_v0 }
0x15d1   :  { %4109 = vmatprep.subr.bf16.mxu1 %v4420_v14 }
0x15d4   :  { %4111 = vmatpush3.bf16.msra.mxu1 %v4679_v47  ;;  %v4241_v47 = vld [vmem:[#allocation6] ss:$0 sm:$0xff] }
0x168a   :  { %v2608_v50 = vpop.f32.mrb[18].mxu1 }
0x168b   :  { %v2609_v62 = vadd.f32 %v4717_v55, %v2608_v50  ;;  %v3843_v63 = vpop.f32.mrb[19].mxu1 }
0x168d   :  { %v2613_v1 = vmin.f32 %v2609_v62, 0.0  ;;  %v2612_v2 = vmax.f32 %v2609_v62, 0.0 }
0x168f   :  { %v2614_v54 = vmul.f32 %v2613_v1, %v4723_v59 }
0x1691   :  { %v2615_v4 = vadd.f32 %v2614_v54, %v2612_v2 }
0x1693   :  { %2616 = vst [vmem:[%s5096_s10 + $0xa] sm:$0x3] %v2615_v4 }
0x169a   :  { %v2849_v44 = vpop.f32.mrb[20].mxu1 }
0x169b   :  { %v4124_v5 = vadd.f32 %v4642_v26, %v2849_v44  ;;  %v3876_v6 = vpop.f32.mrb[21].mxu1 }
0x169d   :  { %4229 = vtanh.f32 %v4124_v5 }
0x16a2   :  { %v3020_v7 = vpop.f32.mrb[6].mxu1 }
0x16a3   :  { %v4118_v8 = vadd.f32 %v4241_v47, %v3020_v7  ;;  %v3898_v9 = vpop.f32.mrb[7].mxu1 }
0x16a5   :  { %4231 = vtanh.f32 %v4118_v8 }
0x16a7   :  { %v4230_v10 = vpop.eup %4229 }
0x16a8   :  { %2859 = vrot.lane.b32.xlu1 %v4230_v10, %s4417_s0  ;;  %v2855_v12 = vmul.f32 0.5, %v4230_v10 }
0x16aa   :  { %v2856_v13 = vadd.f32 0.5, %v2855_v12 }
0x16ac   :  { %v2857_v22 = vmul.f32 %v2856_v13, %v4970_v46 }
0x16af   :  { %v4232_v11 = vpop.eup %4231 }
0x16b0   :  { %3030 = vrot.lane.b32.xlu0 %v4232_v11, %s4417_s0  ;;  %v3026_v26 = vmul.f32 0.5, %v4232_v11 }
0x16b2   :  { %v3027_v17 = vadd.f32 0.5, %v3026_v26 }
0x16b4   :  { %v3028_v28 = vmul.f32 %v3027_v17, %v4974_v51 }
0x171a   :  { %v2860_v15 = vpop.permute.xlu1 %2859 }
0x171b   :  { %v2862_v16 = vmul.f32 %v2860_v15, %v2856_v13 }
0x171d   :  { %2864 = vrot.lane.b32.xlu1 %v2862_v16, %s4423_s28 }
0x1722   :  { %v3031_v18 = vpop.permute.xlu0 %3030 }
0x1723   :  { %v3033_v19 = vmul.f32 %v3031_v18, %v3027_v17 }
0x1725   :  { %3035 = vrot.lane.b32.xlu0 %v3033_v19, %s4423_s28 }
0x178f   :  { %v2865_v23 = vpop.permute.xlu1 %2864 }
0x1790   :  { %v2867_v25 = vadd.f32 %v2865_v23, %v2857_v22 }
0x1792   :  { %4233 = vtanh.f32 %v2867_v25 }
0x1797   :  { %v3036_v29 = vpop.permute.xlu0 %3035 }
0x1798   :  { %v3038_v30 = vadd.f32 %v3036_v29, %v3028_v28 }
0x179a   :  { %4235 = vtanh.f32 %v3038_v30 }
0x179c   :  { %v4234_v31 = vpop.eup %4233 }
0x179d   :  { %2870 = vrot.lane.b32.xlu1 %v4234_v31, %s4417_s0 }
0x17a4   :  { %v4236_v32 = vpop.eup %4235 }
0x17a5   :  { %3041 = vrot.lane.b32.xlu0 %v4236_v32, %s4417_s0 }
0x180f   :  { %v2871_v33 = vpop.permute.xlu1 %2870 }
0x1810   :  { %v2873_v35 = vmul.f32 %v2871_v33, %v2856_v13 }
0x1812   :  { %2875 = vrot.lane.b32.xlu1 %v2873_v35, %s4423_s28 }
0x1817   :  { %v3042_v36 = vpop.permute.xlu0 %3041 }
0x1818   :  { %v3044_v37 = vmul.f32 %v3042_v36, %v3027_v17 }
0x181a   :  { %3046 = vrot.lane.b32.xlu0 %v3044_v37, %s4423_s28 }
0x1884   :  { %v2876_v38 = vpop.permute.xlu1 %2875 }
0x1885   :  { %3886 = vmatmul.mubr.msk.f32.vlgmr.msra.gmra.mrb[20].mxu0 %vm750_vm3, %v2876_v38 }
0x1886   :  { %4096 = vmatpush3.bf16.msra.mxu0 %v4614_v20  ;;  %3907 = vmatprep.mubr.msk.f32.mxu0 %vm4416_vm0, %v4415_v0 }
0x1887   :  { %4097 = vmatprep.subr.bf16.mxu0 %v4420_v14 }
0x188a   :  { %4099 = vmatpush3.bf16.msra.mxu0 %v4625_v24 }
0x188b   :  { %4100 = vmatprep.subr.bf16.mxu0 %v4420_v14 }
0x188c   :  { %v3047_v39 = vpop.permute.xlu0 %3046 }
0x188d   :  { %3293 = vst.msk [vmem:[#allocation12] sm:$0x3] %vm3292_vm4, %v3047_v39  ;;  %3908 = vmatmul.mubr.msk.f32.vlgmr.msra.gmra.mrb[22].mxu0 %vm750_vm3, %v3047_v39 }
0x188e   :  { %4102 = vmatpush3.bf16.msra.mxu0 %v4734_v21  ;;  %3918 = vmatprep.mubr.msk.f32.mxu0 %vm4416_vm0, %v4415_v0  ;;  %v4242_v21 = vld [vmem:[#allocation8] ss:$0 sm:$0xff] }
0x188f   :  { %4103 = vmatprep.subr.bf16.mxu0 %v4420_v14 }
0x1892   :  { %4105 = vmatpush3.bf16.msra.mxu0 %v4738_v27 }
0x1895   :  { %3919 = vmatmul.mubr.msk.f32.vlgmr.msra.gmra.mrb[22].mxu0 %vm750_vm3, %v2876_v38 }
0x1958   :  { %v2945_v20 = vpop.f32.mrb[20].mxu0 }
0x1959   :  { %v2946_v24 = vadd.f32 %v4717_v55, %v2945_v20  ;;  %v3887_v40 = vpop.f32.mrb[21].mxu0 }
0x195b   :  { %v2950_v41 = vmin.f32 %v2946_v24, 0.0  ;;  %v2949_v42 = vmax.f32 %v2946_v24, 0.0 }
0x195d   :  { %v2951_v43 = vmul.f32 %v2950_v41, %v4723_v59 }
0x195f   :  { %v2952_v3 = vadd.f32 %v2951_v43, %v2949_v42 }
0x1961   :  { %2953 = vst [vmem:[%s5096_s10 + $0xc] sm:$0x3] %v2952_v3 }
0x1968   :  { %v3186_v0 = vpop.f32.mrb[22].mxu0 }
0x1969   :  { %v4125_v14 = vadd.f32 %v4242_v21, %v3186_v0  ;;  %v3920_v45 = vpop.f32.mrb[23].mxu0 }
0x196b   :  { %4237 = vtanh.f32 %v4125_v14 }
0x1975   :  { %v4238_v27 = vpop.eup %4237 }
0x1976   :  { %3196 = vrot.lane.b32.xlu1 %v4238_v27, %s4417_s0  ;;  %v3192_v46 = vmul.f32 0.5, %v4238_v27 }
0x1978   :  { %v3193_v55 = vadd.f32 0.5, %v3192_v46 }
0x197a   :  { %v3194_v51 = vmul.f32 %v3193_v55, %v2867_v25 }
0x19e8   :  { %v3197_v48 = vpop.permute.xlu1 %3196 }
0x19e9   :  { %v3199_v49 = vmul.f32 %v3197_v48, %v3193_v55 }
0x19eb   :  { %3201 = vrot.lane.b32.xlu0 %v3199_v49, %s4423_s28 }
0x1a5d   :  { %v3202_v34 = vpop.permute.xlu0 %3201 }
0x1a5e   :  { %v3204_v52 = vadd.f32 %v3202_v34, %v3194_v51 }
0x1a60   :  { %4239 = vtanh.f32 %v3204_v52 }
0x1a6a   :  { %v4240_v53 = vpop.eup %4239 }
0x1a6b   :  { %3207 = vrot.lane.b32.xlu1 %v4240_v53, %s4417_s0  ;;  %s4428_s0 = smov [#allocation12]  }
0x1a6c   :  { %s3315_s24 = sshll.u32 %s4428_s0, 4  ;;  %s3316_s24 = int_to_ptr.vmem [resolvable:$true] %s3315_s24 }
0x1a6d   :  { %s4354_s6 = scalar_lea.vmem %s3316_s24, 64  ;;  %p4359_p13 = scmp.lt.s32.totalorder %s3316_s24, %s3316_s24 }
0x1a6e   :  { %p4355_p12 = scmp.ne.s32.totalorder %s3316_s24, %s4354_s6  ;;  %p4360_p0 = scmp.lt.s32.totalorder %s4354_s6, %s4354_s6 }
0x1a6f   :  { %3295 = vrot.lane.b32.xlu1 %v3038_v30, %s4421_s14 }
0x1a70   :  { %p4361_p1 = por %p4360_p0, %p4359_p13 }
0x1a72   :  { %p4362_p2 = pnand %p4361_p1, %p4355_p12 }
0x1add   :  { %v3208_v56 = vpop.permute.xlu1 %3207 }
0x1ade   :  { %v3210_v57 = vmul.f32 %v3208_v56, %v3193_v55 }
0x1ae0   :  { %3212 = vrot.lane.b32.xlu0 %v3210_v57, %s4423_s28 }
0x1ae1   :  { %v3296_v58 = vpop.permute.xlu1 %3295 }
0x1ae2   :  { %3298 = vst.msk [vmem:[#allocation13] sm:$0x3] %vm3292_vm4, %v3296_v58 }
0x1ae4   :  { %3303 = vrot.lane.b32.xlu0 %v3204_v52, %s4421_s14 }
0x1b52   :  { %v3213_v60 = vpop.permute.xlu0 %3212 }
0x1b53   :  { %3301 = vst.msk [vmem:[#allocation12 + $0x2] sm:$0x3] %vm3292_vm4, %v3213_v60  ;;  %3930 = vmatmul.mubr.msk.f32.vlgmr.msra.gmra.mrb[22].mxu1 %vm750_vm3, %v3213_v60 }
0x1b56   :  { %v3304_v61 = vpop.permute.xlu0 %3303 }
0x1b57   :  { %3307 = vst.msk [vmem:[#allocation13 + $0x2] sm:$0x3] %vm3292_vm4, %v3304_v61 }
0x1b58   :  { %4365 = shalt.err (!%p4362_p2)
}
0x1b59   :  { %s4366_s8 = scalar_lea.hbm %s5097_s11, 64 }
0x1b5a   :  { %p4367_p3 = scmp.ne.s32.totalorder %s5097_s11, %s4366_s8  ;;  %p4370_p4 = scmp.lt.u32.totalorder %s4366_s8, %s5097_s11 }
0x1b5c   :  { %p4372_p5 = pnand %p4370_p4, %p4367_p3 }
0x1b5e   :  { %4375 = shalt.err (!%p4372_p5)
}
0x1b5f   :  { %s4430_s1 = smov 2   ;;  %s4376_s9 = scalar_lea.vmem %s3328_s5, 64 }
0x1b60   :  { %3321 = dma.vmem_to_hbm [thread:$0]  %s3316_s24, 64, %s5097_s11, [#allocation5], %s4423_s28, %s4423_s28, %s4430_s1  }
0x1b61   :  { %p4377_p6 = scmp.ne.s32.totalorder %s3328_s5, %s4376_s9  ;;  %p4381_p7 = scmp.lt.s32.totalorder %s3328_s5, %s3328_s5 }
0x1b62   :  { %p4382_p8 = scmp.lt.s32.totalorder %s4376_s9, %s4376_s9 }
0x1b64   :  { %p4383_p9 = por %p4382_p8, %p4381_p7 }
0x1b66   :  { %p4384_p10 = pnand %p4383_p9, %p4377_p6 }
0x1b68   :  { %4387 = shalt.err (!%p4384_p10)
}
0x1b69   :  { %s4388_s19 = scalar_lea.hbm %s5098_s12, 64 }
0x1b6a   :  { %p4389_p11 = scmp.ne.s32.totalorder %s5098_s12, %s4388_s19  ;;  %p4392_p12 = scmp.lt.u32.totalorder %s4388_s19, %s5098_s12 }
0x1b6c   :  { %p4394_p13 = pnand %p4392_p12, %p4389_p11 }
0x1b6e   :  { %4397 = shalt.err (!%p4394_p13)
}
0x1b6f   :  { %3333 = dma.vmem_to_hbm [thread:$0]  %s3328_s5, 64, %s5098_s12, [#allocation14], %s4423_s28, %s4423_s28, %s4430_s1   ;;  %v4243_v62 = vld [vmem:[#allocation11] ss:$0 sm:$0xff] }
0x1c26   :  { %v3282_v50 = vpop.f32.mrb[22].mxu1 }
0x1c27   :  { %v3283_v63 = vadd.f32 %v4243_v62, %v3282_v50  ;;  %v3931_v1 = vpop.f32.mrb[23].mxu1 }
0x1c29   :  { %v3287_v2 = vmin.f32 %v3283_v63, 0.0  ;;  %v3286_v54 = vmax.f32 %v3283_v63, 0.0 }
0x1c2b   :  { %v3288_v4 = vmul.f32 %v3287_v2, %v4723_v59 }
0x1c2d   :  { %v3289_v44 = vadd.f32 %v3288_v4, %v3286_v54 }
0x1c2f   :  { %3290 = vst [vmem:[%s5096_s10 + $0xe] sm:$0x3] %v3289_v44 }
0x1c30   :  { %4404 = dma.done.wait [#allocation5], 64  }
0x1c31   :  { %4405 = vsyncadd [#allocation5], 4294967232 }
0x1c32   :  { %4406 = dma.done.wait [#allocation14], 64  }
0x1c33   :  { %4407 = vsyncadd [#allocation14], 4294967232 }
0x1c34   :  { %3342 = vsyncpa [#allocation4], 1 }
0x1c35   :  { %3343 = vsyncpa [#allocation7], 1 }
0x1c36   :  { %3344 = vsyncpa [#allocation10], 1 }
0x1c37   :  { %3345 = vsyncpa [#allocation5], 1 }
0x1c38   :  { %3346 = vsyncpa [#allocation14], 1 }

</bundles_post_ra>
